<compile_context>
chip_gen: v6e
topology: v6e:2x2x1
jax: 0.10.0
libtpu: 0.0.40
codegen_flags: <defaults>
</compile_context>

<pallas_src>
import functools

import jax
import jax.numpy as jnp
from jax.experimental import pallas as pl
from jax.experimental.pallas import tpu as pltpu


def _round_up(x, m):
    return ((x + m - 1) // m) * m


# ----------------------------------------------------------------------------
# Pallas kernel: GEMM + folded-BN affine + activation epilogue
# ----------------------------------------------------------------------------
def matmul_affine_kernel(x_ref, w_ref, scale_ref, shift_ref, o_ref, *, act):
    """o = act((x @ w) * scale + shift); scale/shift broadcast over rows."""
    y = jnp.dot(x_ref[...], w_ref[...], preferred_element_type=jnp.float32)
    y = y * scale_ref[...] + shift_ref[...]          # f32 epilogue (v5e-safe)
    if act == "relu":
        y = jnp.maximum(y, 0.0)
    elif act == "tanh":
        y = jnp.tanh(y)
    o_ref[...] = y.astype(o_ref.dtype)


def matmul_affine(x, w, scale, shift, *, act, tile_m=512, tile_n=256):
    """act((x @ w) * scale + shift) with lane-dense (128-padded) output columns."""
    m, k = x.shape
    n = w.shape[1]

    # Lane-dense output: pad N (weight columns + scale/shift) to a multiple of
    # 128 so output stores are unmasked; slice back afterwards.
    n_pad = _round_up(n, 128)
    if n_pad != n:
        w = jnp.pad(w, ((0, 0), (0, n_pad - n)))
        scale = jnp.pad(scale, (0, n_pad - n))
        shift = jnp.pad(shift, (0, n_pad - n))

    # Only round M up to the 8-sublane minimum (a few rows at most) -- no full
    # round-up-to-tile copy; partial trailing M blocks are masked by Pallas.
    m_pad = _round_up(m, 8)
    if m_pad != m:
        x = jnp.pad(x, ((0, m_pad - m), (0, 0)))

    tm = tile_m if m_pad > tile_m else m_pad
    tn = tile_n if n_pad % tile_n == 0 else 128
    grid = (pl.cdiv(m_pad, tm), n_pad // tn)

    out = pl.pallas_call(
        functools.partial(matmul_affine_kernel, act=act),
        out_shape=jax.ShapeDtypeStruct((m_pad, n_pad), jnp.float32),
        grid=grid,
        in_specs=[
            pl.BlockSpec((tm, k), lambda i, j: (i, 0)),
            pl.BlockSpec((k, tn), lambda i, j: (0, j)),
            pl.BlockSpec((1, tn), lambda i, j: (0, j)),
            pl.BlockSpec((1, tn), lambda i, j: (0, j)),
        ],
        out_specs=pl.BlockSpec((tm, tn), lambda i, j: (i, j)),
        compiler_params=pltpu.CompilerParams(
            dimension_semantics=("parallel", "parallel")),
    )(x.astype(jnp.bfloat16), w.astype(jnp.bfloat16),
      scale.reshape(1, n_pad).astype(jnp.float32),
      shift.reshape(1, n_pad).astype(jnp.float32))
    return out[:m, :n]


# ----------------------------------------------------------------------------
# ConvTranspose2d layers as GEMMs (patch / weight plumbing stays in plain JAX)
# ----------------------------------------------------------------------------
def _fold_bn(gamma, beta, mean, var, eps=1e-5):
    scale = gamma * jax.lax.rsqrt(var + eps)
    shift = beta - mean * scale
    return scale, shift


def convt_first(x_nhwc, w_ickk, scale, shift):
    """ConvTranspose2d(k=4, s=1, p=0) on a 1x1 input, + BN affine + ReLU.

    out[b, ky, kx, co] = sum_ci z[b, ci] * W[ci, co, ky, kx]  ->  one GEMM.
    """
    b, h, wd, cin = x_nhwc.shape
    assert h == 1 and wd == 1, "first Generator layer expects a 1x1 latent"
    cout, kh = w_ickk.shape[1], w_ickk.shape[2]
    xm = x_nhwc.reshape(b, cin)
    wg = jnp.transpose(w_ickk, (0, 2, 3, 1)).reshape(cin, kh * kh * cout)
    y = matmul_affine(xm, wg, jnp.tile(scale, kh * kh), jnp.tile(shift, kh * kh),
                      act="relu")
    return y.reshape(b, kh, kh, cout)


# (phase p, window offset w) -> kernel tap of the 4x4 transposed-conv weight
# used by output phase p at offset w inside the 3x3 window over the 1-padded
# input (missing entries contribute zero).
_PHASE_TAP = {(0, 0): 3, (0, 1): 1, (1, 1): 2, (1, 2): 0}


def _up2_gemm_weight(w_ickk):
    """(Cin, Cout, 4, 4) transposed-conv weight -> (9*Cin, 4*Cout) GEMM weight."""
    cin, cout = w_ickk.shape[0], w_ickk.shape[1]
    zero = jnp.zeros((cin, cout), w_ickk.dtype)
    rows = []
    for wy in range(3):
        cols = []
        for wx in range(3):
            phases_y = []
            for py in range(2):
                phases_x = []
                for px in range(2):
                    ky = _PHASE_TAP.get((py, wy))
                    kx = _PHASE_TAP.get((px, wx))
                    phases_x.append(zero if (ky is None or kx is None)
                                    else w_ickk[:, :, ky, kx])
                phases_y.append(jnp.stack(phases_x, axis=1))      # (Cin, 2, Cout)
            cols.append(jnp.stack(phases_y, axis=1))              # (Cin, 2, 2, Cout)
        rows.append(jnp.stack(cols, axis=0))                      # (3, Cin, 2, 2, Cout)
    wg = jnp.stack(rows, axis=0)                                  # (3, 3, Cin, 2, 2, Cout)
    return wg.reshape(9 * cin, 4 * cout)


def convt_up2(x_nhwc, w_ickk, scale, shift, *, act):
    """ConvTranspose2d(k=4, s=2, p=1) + affine + activation via sub-pixel GEMM."""
    b, h, wd, cin = x_nhwc.shape
    cout = w_ickk.shape[1]
    xp = jnp.pad(x_nhwc, ((0, 0), (1, 1), (1, 1), (0, 0)))
    # 3x3 "valid" im2col over the padded input: (B*H*W, 9*Cin)
    taps = [xp[:, wy:wy + h, wx:wx + wd, :] for wy in range(3) for wx in range(3)]
    patches = jnp.concatenate(taps, axis=-1).reshape(b * h * wd, 9 * cin)
    wg = _up2_gemm_weight(w_ickk)
    y = matmul_affine(patches, wg, jnp.tile(scale, 4), jnp.tile(shift, 4), act=act)
    # pixel shuffle: (B, H, W, py, px, Cout) -> (B, 2H, 2W, Cout)
    y = y.reshape(b, h, wd, 2, 2, cout)
    y = jnp.transpose(y, (0, 1, 3, 2, 4, 5)).reshape(b, 2 * h, 2 * wd, cout)
    return y


# ----------------------------------------------------------------------------
# Generator forward
# ----------------------------------------------------------------------------
def generator_forward(params, z_nchw):
    layers = params["layers"]
    x = jnp.transpose(z_nchw, (0, 2, 3, 1))                       # NCHW -> NHWC
    p = layers[0]
    s, sh = _fold_bn(p["gamma"], p["beta"], p["mean"], p["var"])
    x = convt_first(x, p["w"], s, sh)
    for p in layers[1:4]:
        s, sh = _fold_bn(p["gamma"], p["beta"], p["mean"], p["var"])
        x = convt_up2(x, p["w"], s, sh, act="relu")
    p = layers[4]                                                 # no BN, Tanh
    cout = p["w"].shape[1]
    x = convt_up2(x, p["w"], jnp.ones((cout,), jnp.float32),
                  jnp.zeros((cout,), jnp.float32), act="tanh")
    return jnp.transpose(x, (0, 3, 1, 2))                         # NHWC -> NCHW


# ----------------------------------------------------------------------------
# Pure-JAX reference (lax.conv_general_dilated) for a numerical check
# ----------------------------------------------------------------------------
def _conv_transpose_ref(x_nchw, w_ickk, stride, pad):
    k = w_ickk.shape[2]
    rhs = jnp.transpose(w_ickk[:, :, ::-1, ::-1], (1, 0, 2, 3))   # OIHW, flipped
    return jax.lax.conv_general_dilated(
        x_nchw, rhs, window_strides=(1, 1),
        padding=[(k - 1 - pad, k - 1 - pad)] * 2,
        lhs_dilation=(stride, stride),
        dimension_numbers=("NCHW", "OIHW", "NCHW"),
        precision=jax.lax.Precision.HIGHEST)


def generator_ref(params, z_nchw, eps=1e-5):
    layers = params["layers"]
    x = z_nchw
    for i, p in enumerate(layers[:4]):
        stride, pad = (1, 0) if i == 0 else (2, 1)
        x = _conv_transpose_ref(x, p["w"], stride, pad)
        s = (p["gamma"] / jnp.sqrt(p["var"] + eps))[None, :, None, None]
        x = (x - p["mean"][None, :, None, None]) * s + p["beta"][None, :, None, None]
        x = jnp.maximum(x, 0.0)
    x = _conv_transpose_ref(x, layers[4]["w"], 2, 1)
    return jnp.tanh(x)


# ----------------------------------------------------------------------------
# Parameters
# ----------------------------------------------------------------------------
def init_params(key, input_dim=64, filter_num=32):
    keys = iter(jax.random.split(key, 32))

    def nrm(shape, s=0.02):
        return s * jax.random.normal(next(keys), shape, jnp.float32)

    def bn(c):  # randomized running stats to exercise the BN folding path
        return dict(gamma=1.0 + nrm((c,), 0.05), beta=nrm((c,), 0.05),
                    mean=nrm((c,), 0.05), var=1.0 + jnp.abs(nrm((c,), 0.05)))

    chans = [filter_num, filter_num // 2, filter_num // 4, filter_num // 8, 3]
    layers = []
    cin = input_dim
    for i, cout in enumerate(chans):
        layer = dict(w=nrm((cin, cout, 4, 4)))     # ConvTranspose2d weight, bias=False
        if i < 4:
            layer.update(bn(cout))
        layers.append(layer)
        cin = cout
    return dict(layers=layers)


if __name__ == "__main__":
    key = jax.random.PRNGKey(0)
    pkey, zkey = jax.random.split(key)
    input_dim, filter_num, batch = 64, 32, 2       # small widths (PyTorch default 1024)
    params = init_params(pkey, input_dim=input_dim, filter_num=filter_num)
    z = jax.random.normal(zkey, (batch, input_dim, 1, 1), jnp.float32)

    fwd = jax.jit(generator_forward)
    out = fwd(params, z)
    jax.block_until_ready(out)

    assert out.shape == (batch, 3, 64, 64), out.shape
    assert bool(jnp.all(jnp.isfinite(out)))
    ref = generator_ref(params, z)
    err = float(jnp.max(jnp.abs(out - ref)))
    assert err < 3e-2, f"max abs err vs reference: {err}"
    print("KERNEL_OK")
</pallas_src>

<mosaic_0001>
module attributes {stable_mosaic.version = 11 : i64} {
  func.func @matmul_affine_kernel(%arg0: i32, %arg1: i32, %arg2: memref<8x64xbf16, #tpu.memory_space<vmem>>, %arg3: memref<64x256xbf16, #tpu.memory_space<vmem>>, %arg4: memref<1x256xf32, #tpu.memory_space<vmem>>, %arg5: memref<1x256xf32, #tpu.memory_space<vmem>>, %arg6: memref<8x256xf32, #tpu.memory_space<vmem>>) attributes {dimension_semantics = [#tpu.dimension_semantics<parallel>, #tpu.dimension_semantics<parallel>], iteration_bounds = array<i64: 1, 2>, scalar_prefetch = 0 : i64, scratch_operands = 0 : i64, tpu.core_type = #tpu.core_type<tc>, window_params = [{transform_indices = @transform_0, window_bounds = array<i64: 8, 64>}, {transform_indices = @transform_1, window_bounds = array<i64: 64, 256>}, {transform_indices = @transform_2, window_bounds = array<i64: 1, 256>}, {transform_indices = @transform_3, window_bounds = array<i64: 1, 256>}, {transform_indices = @transform_4, window_bounds = array<i64: 8, 256>}]} {
    %c0 = arith.constant 0 : index
    %c0_0 = arith.constant 0 : index
    %0 = vector.load %arg2[%c0, %c0_0] : memref<8x64xbf16, #tpu.memory_space<vmem>>, vector<8x64xbf16>
    %c0_1 = arith.constant 0 : index
    %c0_2 = arith.constant 0 : index
    %1 = vector.load %arg3[%c0_1, %c0_2] : memref<64x256xbf16, #tpu.memory_space<vmem>>, vector<64x256xbf16>
    %cst = arith.constant dense<0.000000e+00> : vector<8x256xf32>
    %2 = tpu.matmul %0, %1, %cst {dimension_numbers = #tpu.dot_dimension_numbers<[1], [0], [0], [1], [0, 0, 1, 1], [], []>} : vector<8x64xbf16>, vector<64x256xbf16>, vector<8x256xf32> -> vector<8x256xf32>
    %c0_3 = arith.constant 0 : index
    %c0_4 = arith.constant 0 : index
    %3 = vector.load %arg4[%c0_3, %c0_4] : memref<1x256xf32, #tpu.memory_space<vmem>>, vector<1x256xf32>
    %4 = vector.broadcast %3 : vector<1x256xf32> to vector<8x256xf32>
    %5 = arith.mulf %2, %4 : vector<8x256xf32>
    %c0_5 = arith.constant 0 : index
    %c0_6 = arith.constant 0 : index
    %6 = vector.load %arg5[%c0_5, %c0_6] : memref<1x256xf32, #tpu.memory_space<vmem>>, vector<1x256xf32>
    %7 = vector.broadcast %6 : vector<1x256xf32> to vector<8x256xf32>
    %8 = arith.addf %5, %7 : vector<8x256xf32>
    %cst_7 = arith.constant 0.000000e+00 : f32
    %9 = vector.broadcast %cst_7 : f32 to vector<8x256xf32>
    %10 = arith.maximumf %8, %9 : vector<8x256xf32>
    %c0_8 = arith.constant 0 : index
    %c0_9 = arith.constant 0 : index
    %11 = vector.load %arg6[%c0_8, %c0_9] : memref<8x256xf32, #tpu.memory_space<vmem>>, vector<8x256xf32>
    tpu.vector_store %arg6[%c0_8, %c0_9], %10 {strides = array<i32>} : memref<8x256xf32, #tpu.memory_space<vmem>>, vector<8x256xf32>,
    return
  }
  func.func @transform_0(%arg0: i32, %arg1: i32) -> (i32, i32) {
    %c0_i32 = arith.constant 0 : i32
    %c0_i32_0 = arith.constant 0 : i32
    return %arg0, %c0_i32 : i32, i32
  }
  func.func @transform_1(%arg0: i32, %arg1: i32) -> (i32, i32) {
    %c0_i32 = arith.constant 0 : i32
    %c0_i32_0 = arith.constant 0 : i32
    return %c0_i32, %arg1 : i32, i32
  }
  func.func @transform_2(%arg0: i32, %arg1: i32) -> (i32, i32) {
    %c0_i32 = arith.constant 0 : i32
    %c0_i32_0 = arith.constant 0 : i32
    return %c0_i32, %arg1 : i32, i32
  }
  func.func @transform_3(%arg0: i32, %arg1: i32) -> (i32, i32) {
    %c0_i32 = arith.constant 0 : i32
    %c0_i32_0 = arith.constant 0 : i32
    return %c0_i32, %arg1 : i32, i32
  }
  func.func @transform_4(%arg0: i32, %arg1: i32) -> (i32, i32) {
    %c0_i32 = arith.constant 0 : i32
    return %arg0, %arg1 : i32, i32
  }
}

module attributes {stable_mosaic.version = 11 : i64} {
  func.func @matmul_affine_kernel(%arg0: i32, %arg1: i32, %arg2: memref<32x288xbf16, #tpu.memory_space<vmem>>, %arg3: memref<288x128xbf16, #tpu.memory_space<vmem>>, %arg4: memref<1x128xf32, #tpu.memory_space<vmem>>, %arg5: memref<1x128xf32, #tpu.memory_space<vmem>>, %arg6: memref<32x128xf32, #tpu.memory_space<vmem>>) attributes {dimension_semantics = [#tpu.dimension_semantics<parallel>, #tpu.dimension_semantics<parallel>], iteration_bounds = array<i64: 1, 1>, scalar_prefetch = 0 : i64, scratch_operands = 0 : i64, tpu.core_type = #tpu.core_type<tc>, window_params = [{transform_indices = @transform_0, window_bounds = array<i64: 32, 288>}, {transform_indices = @transform_1, window_bounds = array<i64: 288, 128>}, {transform_indices = @transform_2, window_bounds = array<i64: 1, 128>}, {transform_indices = @transform_3, window_bounds = array<i64: 1, 128>}, {transform_indices = @transform_4, window_bounds = array<i64: 32, 128>}]} {
    %c0 = arith.constant 0 : index
    %c0_0 = arith.constant 0 : index
    %0 = vector.load %arg2[%c0, %c0_0] : memref<32x288xbf16, #tpu.memory_space<vmem>>, vector<32x288xbf16>
    %c0_1 = arith.constant 0 : index
    %c0_2 = arith.constant 0 : index
    %1 = vector.load %arg3[%c0_1, %c0_2] : memref<288x128xbf16, #tpu.memory_space<vmem>>, vector<288x128xbf16>
    %cst = arith.constant dense<0.000000e+00> : vector<32x128xf32>
    %2 = tpu.matmul %0, %1, %cst {dimension_numbers = #tpu.dot_dimension_numbers<[1], [0], [0], [1], [0, 0, 1, 1], [], []>} : vector<32x288xbf16>, vector<288x128xbf16>, vector<32x128xf32> -> vector<32x128xf32>
    %c0_3 = arith.constant 0 : index
    %c0_4 = arith.constant 0 : index
    %3 = vector.load %arg4[%c0_3, %c0_4] : memref<1x128xf32, #tpu.memory_space<vmem>>, vector<1x128xf32>
    %4 = vector.broadcast %3 : vector<1x128xf32> to vector<32x128xf32>
    %5 = arith.mulf %2, %4 : vector<32x128xf32>
    %c0_5 = arith.constant 0 : index
    %c0_6 = arith.constant 0 : index
    %6 = vector.load %arg5[%c0_5, %c0_6] : memref<1x128xf32, #tpu.memory_space<vmem>>, vector<1x128xf32>
    %7 = vector.broadcast %6 : vector<1x128xf32> to vector<32x128xf32>
    %8 = arith.addf %5, %7 : vector<32x128xf32>
    %cst_7 = arith.constant 0.000000e+00 : f32
    %9 = vector.broadcast %cst_7 : f32 to vector<32x128xf32>
    %10 = arith.maximumf %8, %9 : vector<32x128xf32>
    %c0_8 = arith.constant 0 : index
    %c0_9 = arith.constant 0 : index
    %11 = vector.load %arg6[%c0_8, %c0_9] : memref<32x128xf32, #tpu.memory_space<vmem>>, vector<32x128xf32>
    tpu.vector_store %arg6[%c0_8, %c0_9], %10 {strides = array<i32>} : memref<32x128xf32, #tpu.memory_space<vmem>>, vector<32x128xf32>,
    return
  }
  func.func @transform_0(%arg0: i32, %arg1: i32) -> (i32, i32) {
    %c0_i32 = arith.constant 0 : i32
    %c0_i32_0 = arith.constant 0 : i32
    return %arg0, %c0_i32 : i32, i32
  }
  func.func @transform_1(%arg0: i32, %arg1: i32) -> (i32, i32) {
    %c0_i32 = arith.constant 0 : i32
    %c0_i32_0 = arith.constant 0 : i32
    return %c0_i32, %arg1 : i32, i32
  }
  func.func @transform_2(%arg0: i32, %arg1: i32) -> (i32, i32) {
    %c0_i32 = arith.constant 0 : i32
    %c0_i32_0 = arith.constant 0 : i32
    return %c0_i32, %arg1 : i32, i32
  }
  func.func @transform_3(%arg0: i32, %arg1: i32) -> (i32, i32) {
    %c0_i32 = arith.constant 0 : i32
    %c0_i32_0 = arith.constant 0 : i32
    return %c0_i32, %arg1 : i32, i32
  }
  func.func @transform_4(%arg0: i32, %arg1: i32) -> (i32, i32) {
    %c0_i32 = arith.constant 0 : i32
    return %arg0, %arg1 : i32, i32
  }
}

module attributes {stable_mosaic.version = 11 : i64} {
  func.func @matmul_affine_kernel(%arg0: i32, %arg1: i32, %arg2: memref<128x144xbf16, #tpu.memory_space<vmem>>, %arg3: memref<144x128xbf16, #tpu.memory_space<vmem>>, %arg4: memref<1x128xf32, #tpu.memory_space<vmem>>, %arg5: memref<1x128xf32, #tpu.memory_space<vmem>>, %arg6: memref<128x128xf32, #tpu.memory_space<vmem>>) attributes {dimension_semantics = [#tpu.dimension_semantics<parallel>, #tpu.dimension_semantics<parallel>], iteration_bounds = array<i64: 1, 1>, scalar_prefetch = 0 : i64, scratch_operands = 0 : i64, tpu.core_type = #tpu.core_type<tc>, window_params = [{transform_indices = @transform_0, window_bounds = array<i64: 128, 144>}, {transform_indices = @transform_1, window_bounds = array<i64: 144, 128>}, {transform_indices = @transform_2, window_bounds = array<i64: 1, 128>}, {transform_indices = @transform_3, window_bounds = array<i64: 1, 128>}, {transform_indices = @transform_4, window_bounds = array<i64: 128, 128>}]} {
    %c0 = arith.constant 0 : index
    %c0_0 = arith.constant 0 : index
    %0 = vector.load %arg2[%c0, %c0_0] : memref<128x144xbf16, #tpu.memory_space<vmem>>, vector<128x144xbf16>
    %c0_1 = arith.constant 0 : index
    %c0_2 = arith.constant 0 : index
    %1 = vector.load %arg3[%c0_1, %c0_2] : memref<144x128xbf16, #tpu.memory_space<vmem>>, vector<144x128xbf16>
    %cst = arith.constant dense<0.000000e+00> : vector<128x128xf32>
    %2 = tpu.matmul %0, %1, %cst {dimension_numbers = #tpu.dot_dimension_numbers<[1], [0], [0], [1], [0, 0, 1, 1], [], []>} : vector<128x144xbf16>, vector<144x128xbf16>, vector<128x128xf32> -> vector<128x128xf32>
    %c0_3 = arith.constant 0 : index
    %c0_4 = arith.constant 0 : index
    %3 = vector.load %arg4[%c0_3, %c0_4] : memref<1x128xf32, #tpu.memory_space<vmem>>, vector<1x128xf32>
    %4 = vector.broadcast %3 : vector<1x128xf32> to vector<128x128xf32>
    %5 = arith.mulf %2, %4 : vector<128x128xf32>
    %c0_5 = arith.constant 0 : index
    %c0_6 = arith.constant 0 : index
    %6 = vector.load %arg5[%c0_5, %c0_6] : memref<1x128xf32, #tpu.memory_space<vmem>>, vector<1x128xf32>
    %7 = vector.broadcast %6 : vector<1x128xf32> to vector<128x128xf32>
    %8 = arith.addf %5, %7 : vector<128x128xf32>
    %cst_7 = arith.constant 0.000000e+00 : f32
    %9 = vector.broadcast %cst_7 : f32 to vector<128x128xf32>
    %10 = arith.maximumf %8, %9 : vector<128x128xf32>
    %c0_8 = arith.constant 0 : index
    %c0_9 = arith.constant 0 : index
    %11 = vector.load %arg6[%c0_8, %c0_9] : memref<128x128xf32, #tpu.memory_space<vmem>>, vector<128x128xf32>
    tpu.vector_store %arg6[%c0_8, %c0_9], %10 {strides = array<i32>} : memref<128x128xf32, #tpu.memory_space<vmem>>, vector<128x128xf32>,
    return
  }
  func.func @transform_0(%arg0: i32, %arg1: i32) -> (i32, i32) {
    %c0_i32 = arith.constant 0 : i32
    %c0_i32_0 = arith.constant 0 : i32
    return %arg0, %c0_i32 : i32, i32
  }
  func.func @transform_1(%arg0: i32, %arg1: i32) -> (i32, i32) {
    %c0_i32 = arith.constant 0 : i32
    %c0_i32_0 = arith.constant 0 : i32
    return %c0_i32, %arg1 : i32, i32
  }
  func.func @transform_2(%arg0: i32, %arg1: i32) -> (i32, i32) {
    %c0_i32 = arith.constant 0 : i32
    %c0_i32_0 = arith.constant 0 : i32
    return %c0_i32, %arg1 : i32, i32
  }
  func.func @transform_3(%arg0: i32, %arg1: i32) -> (i32, i32) {
    %c0_i32 = arith.constant 0 : i32
    %c0_i32_0 = arith.constant 0 : i32
    return %c0_i32, %arg1 : i32, i32
  }
  func.func @transform_4(%arg0: i32, %arg1: i32) -> (i32, i32) {
    %c0_i32 = arith.constant 0 : i32
    return %arg0, %arg1 : i32, i32
  }
}

module attributes {stable_mosaic.version = 11 : i64} {
  func.func @matmul_affine_kernel(%arg0: i32, %arg1: i32, %arg2: memref<512x72xbf16, #tpu.memory_space<vmem>>, %arg3: memref<72x128xbf16, #tpu.memory_space<vmem>>, %arg4: memref<1x128xf32, #tpu.memory_space<vmem>>, %arg5: memref<1x128xf32, #tpu.memory_space<vmem>>, %arg6: memref<512x128xf32, #tpu.memory_space<vmem>>) attributes {dimension_semantics = [#tpu.dimension_semantics<parallel>, #tpu.dimension_semantics<parallel>], iteration_bounds = array<i64: 1, 1>, scalar_prefetch = 0 : i64, scratch_operands = 0 : i64, tpu.core_type = #tpu.core_type<tc>, window_params = [{transform_indices = @transform_0, window_bounds = array<i64: 512, 72>}, {transform_indices = @transform_1, window_bounds = array<i64: 72, 128>}, {transform_indices = @transform_2, window_bounds = array<i64: 1, 128>}, {transform_indices = @transform_3, window_bounds = array<i64: 1, 128>}, {transform_indices = @transform_4, window_bounds = array<i64: 512, 128>}]} {
    %c0 = arith.constant 0 : index
    %c0_0 = arith.constant 0 : index
    %0 = vector.load %arg2[%c0, %c0_0] : memref<512x72xbf16, #tpu.memory_space<vmem>>, vector<512x72xbf16>
    %c0_1 = arith.constant 0 : index
    %c0_2 = arith.constant 0 : index
    %1 = vector.load %arg3[%c0_1, %c0_2] : memref<72x128xbf16, #tpu.memory_space<vmem>>, vector<72x128xbf16>
    %cst = arith.constant dense<0.000000e+00> : vector<512x128xf32>
    %2 = tpu.matmul %0, %1, %cst {dimension_numbers = #tpu.dot_dimension_numbers<[1], [0], [0], [1], [0, 0, 1, 1], [], []>} : vector<512x72xbf16>, vector<72x128xbf16>, vector<512x128xf32> -> vector<512x128xf32>
    %c0_3 = arith.constant 0 : index
    %c0_4 = arith.constant 0 : index
    %3 = vector.load %arg4[%c0_3, %c0_4] : memref<1x128xf32, #tpu.memory_space<vmem>>, vector<1x128xf32>
    %4 = vector.broadcast %3 : vector<1x128xf32> to vector<512x128xf32>
    %5 = arith.mulf %2, %4 : vector<512x128xf32>
    %c0_5 = arith.constant 0 : index
    %c0_6 = arith.constant 0 : index
    %6 = vector.load %arg5[%c0_5, %c0_6] : memref<1x128xf32, #tpu.memory_space<vmem>>, vector<1x128xf32>
    %7 = vector.broadcast %6 : vector<1x128xf32> to vector<512x128xf32>
    %8 = arith.addf %5, %7 : vector<512x128xf32>
    %cst_7 = arith.constant 0.000000e+00 : f32
    %9 = vector.broadcast %cst_7 : f32 to vector<512x128xf32>
    %10 = arith.maximumf %8, %9 : vector<512x128xf32>
    %c0_8 = arith.constant 0 : index
    %c0_9 = arith.constant 0 : index
    %11 = vector.load %arg6[%c0_8, %c0_9] : memref<512x128xf32, #tpu.memory_space<vmem>>, vector<512x128xf32>
    tpu.vector_store %arg6[%c0_8, %c0_9], %10 {strides = array<i32>} : memref<512x128xf32, #tpu.memory_space<vmem>>, vector<512x128xf32>,
    return
  }
  func.func @transform_0(%arg0: i32, %arg1: i32) -> (i32, i32) {
    %c0_i32 = arith.constant 0 : i32
    %c0_i32_0 = arith.constant 0 : i32
    return %arg0, %c0_i32 : i32, i32
  }
  func.func @transform_1(%arg0: i32, %arg1: i32) -> (i32, i32) {
    %c0_i32 = arith.constant 0 : i32
    %c0_i32_0 = arith.constant 0 : i32
    return %c0_i32, %arg1 : i32, i32
  }
  func.func @transform_2(%arg0: i32, %arg1: i32) -> (i32, i32) {
    %c0_i32 = arith.constant 0 : i32
    %c0_i32_0 = arith.constant 0 : i32
    return %c0_i32, %arg1 : i32, i32
  }
  func.func @transform_3(%arg0: i32, %arg1: i32) -> (i32, i32) {
    %c0_i32 = arith.constant 0 : i32
    %c0_i32_0 = arith.constant 0 : i32
    return %c0_i32, %arg1 : i32, i32
  }
  func.func @transform_4(%arg0: i32, %arg1: i32) -> (i32, i32) {
    %c0_i32 = arith.constant 0 : i32
    return %arg0, %arg1 : i32, i32
  }
}

module attributes {stable_mosaic.version = 11 : i64} {
  func.func @matmul_affine_kernel(%arg0: i32, %arg1: i32, %arg2: memref<512x36xbf16, #tpu.memory_space<vmem>>, %arg3: memref<36x128xbf16, #tpu.memory_space<vmem>>, %arg4: memref<1x128xf32, #tpu.memory_space<vmem>>, %arg5: memref<1x128xf32, #tpu.memory_space<vmem>>, %arg6: memref<512x128xf32, #tpu.memory_space<vmem>>) attributes {dimension_semantics = [#tpu.dimension_semantics<parallel>, #tpu.dimension_semantics<parallel>], iteration_bounds = array<i64: 4, 1>, scalar_prefetch = 0 : i64, scratch_operands = 0 : i64, tpu.core_type = #tpu.core_type<tc>, window_params = [{transform_indices = @transform_0, window_bounds = array<i64: 512, 36>}, {transform_indices = @transform_1, window_bounds = array<i64: 36, 128>}, {transform_indices = @transform_2, window_bounds = array<i64: 1, 128>}, {transform_indices = @transform_3, window_bounds = array<i64: 1, 128>}, {transform_indices = @transform_4, window_bounds = array<i64: 512, 128>}]} {
    %c0 = arith.constant 0 : index
    %c0_0 = arith.constant 0 : index
    %0 = vector.load %arg2[%c0, %c0_0] : memref<512x36xbf16, #tpu.memory_space<vmem>>, vector<512x36xbf16>
    %c0_1 = arith.constant 0 : index
    %c0_2 = arith.constant 0 : index
    %1 = vector.load %arg3[%c0_1, %c0_2] : memref<36x128xbf16, #tpu.memory_space<vmem>>, vector<36x128xbf16>
    %cst = arith.constant dense<0.000000e+00> : vector<512x128xf32>
    %2 = tpu.matmul %0, %1, %cst {dimension_numbers = #tpu.dot_dimension_numbers<[1], [0], [0], [1], [0, 0, 1, 1], [], []>} : vector<512x36xbf16>, vector<36x128xbf16>, vector<512x128xf32> -> vector<512x128xf32>
    %c0_3 = arith.constant 0 : index
    %c0_4 = arith.constant 0 : index
    %3 = vector.load %arg4[%c0_3, %c0_4] : memref<1x128xf32, #tpu.memory_space<vmem>>, vector<1x128xf32>
    %4 = vector.broadcast %3 : vector<1x128xf32> to vector<512x128xf32>
    %5 = arith.mulf %2, %4 : vector<512x128xf32>
    %c0_5 = arith.constant 0 : index
    %c0_6 = arith.constant 0 : index
    %6 = vector.load %arg5[%c0_5, %c0_6] : memref<1x128xf32, #tpu.memory_space<vmem>>, vector<1x128xf32>
    %7 = vector.broadcast %6 : vector<1x128xf32> to vector<512x128xf32>
    %8 = arith.addf %5, %7 : vector<512x128xf32>
    %9 = math.tanh %8 : vector<512x128xf32>
    %c0_7 = arith.constant 0 : index
    %c0_8 = arith.constant 0 : index
    %10 = vector.load %arg6[%c0_7, %c0_8] : memref<512x128xf32, #tpu.memory_space<vmem>>, vector<512x128xf32>
    tpu.vector_store %arg6[%c0_7, %c0_8], %9 {strides = array<i32>} : memref<512x128xf32, #tpu.memory_space<vmem>>, vector<512x128xf32>,
    return
  }
  func.func @transform_0(%arg0: i32, %arg1: i32) -> (i32, i32) {
    %c0_i32 = arith.constant 0 : i32
    %c0_i32_0 = arith.constant 0 : i32
    return %arg0, %c0_i32 : i32, i32
  }
  func.func @transform_1(%arg0: i32, %arg1: i32) -> (i32, i32) {
    %c0_i32 = arith.constant 0 : i32
    %c0_i32_0 = arith.constant 0 : i32
    return %c0_i32, %arg1 : i32, i32
  }
  func.func @transform_2(%arg0: i32, %arg1: i32) -> (i32, i32) {
    %c0_i32 = arith.constant 0 : i32
    %c0_i32_0 = arith.constant 0 : i32
    return %c0_i32, %arg1 : i32, i32
  }
  func.func @transform_3(%arg0: i32, %arg1: i32) -> (i32, i32) {
    %c0_i32 = arith.constant 0 : i32
    %c0_i32_0 = arith.constant 0 : i32
    return %c0_i32, %arg1 : i32, i32
  }
  func.func @transform_4(%arg0: i32, %arg1: i32) -> (i32, i32) {
    %c0_i32 = arith.constant 0 : i32
    return %arg0, %arg1 : i32, i32
  }
}

</mosaic_0001>

<bundles_post_ra>
// kernel: tile.78
= control target key start
LH: loop header
LB: loop body
LE: loop exit
PB: predicated region body
PF: predicated region fallthrough
CT: control target
= control target key end

     0   :  { %s22_s0 = inlined_call_operand.vmem [shape: f32[4], index: 0, kind: input, shape index: {}]   ;;  %s23_s1 = inlined_call_operand.vmem [shape: f32[4,4], index: 1, kind: output, shape index: {}]  }
   0x1   :  { %v4_v0 = vld [vmem:[%s22_s0] ss:$0 sm:$0xff] }
   0x2   :  { %5 = vst [vmem:[%s23_s1] sm:$0xf] %v4_v0 }

// kernel: tile.68
= control target key start
LH: loop header
LB: loop body
LE: loop exit
PB: predicated region body
PF: predicated region fallthrough
CT: control target
= control target key end

     0   :  { %s22_s0 = inlined_call_operand.vmem [shape: f32[8], index: 0, kind: input, shape index: {}]   ;;  %s23_s1 = inlined_call_operand.vmem [shape: f32[4,8], index: 1, kind: output, shape index: {}]  }
   0x1   :  { %v4_v0 = vld [vmem:[%s22_s0] ss:$0 sm:$0xff] }
   0x2   :  { %5 = vst [vmem:[%s23_s1] sm:$0xf] %v4_v0 }

// kernel: tile.79
= control target key start
LH: loop header
LB: loop body
LE: loop exit
PB: predicated region body
PF: predicated region fallthrough
CT: control target
= control target key end

     0   :  { %vm8_vm0 = vcmask 31744   ;;  %s40_s8 = smov 4   ;;  %s41_s9 = smov 8   ;;  %vm14_vm1 = vcmask 130144   ;;  %vm20_vm2 = vcmask 97344   ;;  %vm26_vm3 = vcmask 64544   ;;  %s58_s0 = inlined_call_operand.vmem [shape: f32[4,4], index: 0, kind: input, shape index: {}]   ;;  %s59_s1 = inlined_call_operand.vmem [shape: f32[16], index: 1, kind: output, shape index: {}]  }
   0x1   :  { %v5_v0 = vld [vmem:[%s58_s0] sm:$0xf]  ;;  %s39_s0 = smov 12  }
   0x2   :  { %6 = vst [vmem:[#allocation1] sm:$0xf] %v5_v0 }
   0x9   :  { %v11_v1 = vld [vmem:[#allocation1 + $0x3] sm:$0x1]   ;;  %v23_v2 = vld [vmem:[#allocation1 + $0x1] sm:$0x1]   ;;  %v7_v3 = vld [vmem:[#allocation1] sm:$0x1]  }
   0xa   :  { %12 = vrot.lane.b32.xlu0 %v11_v1, %s39_s0  ;;  %24 = vrot.lane.b32.xlu1 %v23_v2, %s40_s8  ;;  %v17_v4 = vld [vmem:[#allocation1 + $0x2] sm:$0x1]   ;;  %9 = vst.msk [vmem:[#allocation0] sm:$0x1] %vm8_vm0, %v7_v3  }
   0xe   :  { %18 = vrot.lane.b32.xlu0 %v17_v4, %s41_s9 }
  0x7c   :  { %v13_v5 = vpop.permute.xlu0 %12   ;;  %v25_v6 = vpop.permute.xlu1 %24  }
  0x7d   :  { %15 = vst.msk [vmem:[#allocation0] sm:$0x1] %vm14_vm1, %v13_v5  }
  0x80   :  { %v19_v7 = vpop.permute.xlu0 %18  }
  0x81   :  { %21 = vst.msk [vmem:[#allocation0] sm:$0x1] %vm20_vm2, %v19_v7  }
  0x82   :  { %27 = vst.msk [vmem:[#allocation0] sm:$0x1] %vm26_vm3, %v25_v6  }
  0x89   :  { %v32_v8 = vld [vmem:[#allocation0] sm:$0x1] }
  0x8a   :  { %35 = vst [vmem:[%s59_s1] sm:$0x1] %v32_v8 }

// kernel: tile.69
= control target key start
LH: loop header
LB: loop body
LE: loop exit
PB: predicated region body
PF: predicated region fallthrough
CT: control target
= control target key end

     0   :  { %vm8_vm0 = vcmask 64512   ;;  %s40_s8 = smov 8   ;;  %s41_s9 = smov 16   ;;  %vm14_vm1 = vcmask 261312   ;;  %vm20_vm2 = vcmask 195712   ;;  %vm26_vm3 = vcmask 130112   ;;  %s58_s0 = inlined_call_operand.vmem [shape: f32[4,8], index: 0, kind: input, shape index: {}]   ;;  %s59_s1 = inlined_call_operand.vmem [shape: f32[32], index: 1, kind: output, shape index: {}]  }
   0x1   :  { %v5_v0 = vld [vmem:[%s58_s0] sm:$0xf]  ;;  %s39_s0 = smov 24  }
   0x2   :  { %6 = vst [vmem:[#allocation1] sm:$0xf] %v5_v0 }
   0x9   :  { %v11_v1 = vld [vmem:[#allocation1 + $0x3] sm:$0x1]   ;;  %v23_v2 = vld [vmem:[#allocation1 + $0x1] sm:$0x1]   ;;  %v7_v3 = vld [vmem:[#allocation1] sm:$0x1]  }
   0xa   :  { %12 = vrot.lane.b32.xlu0 %v11_v1, %s39_s0  ;;  %24 = vrot.lane.b32.xlu1 %v23_v2, %s40_s8  ;;  %v17_v4 = vld [vmem:[#allocation1 + $0x2] sm:$0x1]   ;;  %9 = vst.msk [vmem:[#allocation0] sm:$0x1] %vm8_vm0, %v7_v3  }
   0xe   :  { %18 = vrot.lane.b32.xlu0 %v17_v4, %s41_s9 }
  0x7c   :  { %v13_v5 = vpop.permute.xlu0 %12   ;;  %v25_v6 = vpop.permute.xlu1 %24  }
  0x7d   :  { %15 = vst.msk [vmem:[#allocation0] sm:$0x1] %vm14_vm1, %v13_v5  }
  0x80   :  { %v19_v7 = vpop.permute.xlu0 %18  }
  0x81   :  { %21 = vst.msk [vmem:[#allocation0] sm:$0x1] %vm20_vm2, %v19_v7  }
  0x82   :  { %27 = vst.msk [vmem:[#allocation0] sm:$0x1] %vm26_vm3, %v25_v6  }
  0x89   :  { %v32_v8 = vld [vmem:[#allocation0] sm:$0x1] }
  0x8a   :  { %35 = vst [vmem:[%s59_s1] sm:$0x1] %v32_v8 }

// kernel: tile.58
= control target key start
LH: loop header
LB: loop body
LE: loop exit
PB: predicated region body
PF: predicated region fallthrough
CT: control target
= control target key end

     0   :  { %s22_s0 = inlined_call_operand.vmem [shape: f32[16], index: 0, kind: input, shape index: {}]   ;;  %s23_s1 = inlined_call_operand.vmem [shape: f32[4,16], index: 1, kind: output, shape index: {}]  }
   0x1   :  { %v4_v0 = vld [vmem:[%s22_s0] ss:$0 sm:$0xff] }
   0x2   :  { %5 = vst [vmem:[%s23_s1] sm:$0xf] %v4_v0 }

// kernel: tile.59
= control target key start
LH: loop header
LB: loop body
LE: loop exit
PB: predicated region body
PF: predicated region fallthrough
CT: control target
= control target key end

     0   :  { %vm8_vm0 = vcmask 130048   ;;  %s40_s8 = smov 16   ;;  %s41_s9 = smov 32   ;;  %vm14_vm1 = vcmask 523648   ;;  %vm20_vm2 = vcmask 392448   ;;  %vm26_vm3 = vcmask 261248   ;;  %s58_s0 = inlined_call_operand.vmem [shape: f32[4,16], index: 0, kind: input, shape index: {}]   ;;  %s59_s1 = inlined_call_operand.vmem [shape: f32[64], index: 1, kind: output, shape index: {}]  }
   0x1   :  { %v5_v0 = vld [vmem:[%s58_s0] sm:$0xf]  ;;  %s39_s0 = smov 48  }
   0x2   :  { %6 = vst [vmem:[#allocation1] sm:$0xf] %v5_v0 }
   0x9   :  { %v11_v1 = vld [vmem:[#allocation1 + $0x3] sm:$0x1]   ;;  %v23_v2 = vld [vmem:[#allocation1 + $0x1] sm:$0x1]   ;;  %v7_v3 = vld [vmem:[#allocation1] sm:$0x1]  }
   0xa   :  { %12 = vrot.lane.b32.xlu0 %v11_v1, %s39_s0  ;;  %24 = vrot.lane.b32.xlu1 %v23_v2, %s40_s8  ;;  %v17_v4 = vld [vmem:[#allocation1 + $0x2] sm:$0x1]   ;;  %9 = vst.msk [vmem:[#allocation0] sm:$0x1] %vm8_vm0, %v7_v3  }
   0xe   :  { %18 = vrot.lane.b32.xlu0 %v17_v4, %s41_s9 }
  0x7c   :  { %v13_v5 = vpop.permute.xlu0 %12   ;;  %v25_v6 = vpop.permute.xlu1 %24  }
  0x7d   :  { %15 = vst.msk [vmem:[#allocation0] sm:$0x1] %vm14_vm1, %v13_v5  }
  0x80   :  { %v19_v7 = vpop.permute.xlu0 %18  }
  0x81   :  { %21 = vst.msk [vmem:[#allocation0] sm:$0x1] %vm20_vm2, %v19_v7  }
  0x82   :  { %27 = vst.msk [vmem:[#allocation0] sm:$0x1] %vm26_vm3, %v25_v6  }
  0x89   :  { %v32_v8 = vld [vmem:[#allocation0] sm:$0x1] }
  0x8a   :  { %35 = vst [vmem:[%s59_s1] sm:$0x1] %v32_v8 }

// kernel: tile.47
= control target key start
LH: loop header
LB: loop body
LE: loop exit
PB: predicated region body
PF: predicated region fallthrough
CT: control target
= control target key end

     0   :  { %s28_s0 = inlined_call_operand.vmem [shape: f32[32], index: 0, kind: input, shape index: {}]   ;;  %s29_s1 = inlined_call_operand.vmem [shape: f32[16,32], index: 1, kind: output, shape index: {}]  }
   0x1   :  { %v4_v0 = vld [vmem:[%s28_s0] ss:$0 sm:$0xff] }
   0x2   :  { %5 = vst [vmem:[%s29_s1] sm:$0xff] %v4_v0  ;;  %8 = vst [vmem:[%s29_s1 + $0x8] sm:$0xff] %v4_v0 }

// kernel: tile.49
= control target key start
LH: loop header
LB: loop body
LE: loop exit
PB: predicated region body
PF: predicated region fallthrough
CT: control target
= control target key end

     0   :  { %s62_s8 = smov 96   ;;  %vm3_vm0 = vcmask 261120   ;;  %s64_s15 = smov 64   ;;  %vm9_vm1 = vcmask 1048320   ;;  %vm15_vm2 = vcmask 785920   ;;  %vm21_vm3 = vcmask 523520   ;;  %s99_s0 = inlined_call_operand.vmem [shape: f32[16,32], index: 0, kind: input, shape index: {}]   ;;  %s100_s1 = inlined_call_operand.vmem [shape: f32[1,512], index: 1, kind: output, shape index: {}]  }
   0x1   :  { %v53_v0 = vld [vmem:[%s99_s0 + $0x3] ss:$4 sm:$0xf]   ;;  %v54_v1 = vld [vmem:[%s99_s0 + $0x2] ss:$4 sm:$0xf]  }
   0x2   :  { %7 = vrot.lane.b32.xlu0 %v53_v0, %s62_s8  ;;  %v55_v2 = vld [vmem:[%s99_s0 + $0x1] ss:$4 sm:$0xf]   ;;  %v2_v3 = vld [vmem:[%s99_s0] ss:$4 sm:$0xf]  }
   0x3   :  { %s63_s0 = smov 32   ;;  %4 = vst.msk [vmem:[#allocation0] ss:$8 sm:$0xf] %vm3_vm0, %v2_v3  }
   0x4   :  { %19 = vrot.lane.b32.xlu1 %v55_v2, %s63_s0 }
   0x6   :  { %13 = vrot.lane.b32.xlu0 %v54_v1, %s64_s15 }
  0x74   :  { %v8_v4 = vpop.permute.xlu0 %7  }
  0x75   :  { %10 = vst.msk [vmem:[#allocation0] ss:$8 sm:$0xf] %vm9_vm1, %v8_v4  }
  0x76   :  { %v20_v5 = vpop.permute.xlu1 %19  }
  0x78   :  { %v14_v6 = vpop.permute.xlu0 %13  }
  0x79   :  { %16 = vst.msk [vmem:[#allocation0] ss:$8 sm:$0xf] %vm15_vm2, %v14_v6  }
  0x7a   :  { %22 = vst.msk [vmem:[#allocation0] ss:$8 sm:$0xf] %vm21_vm3, %v20_v5  }
  0x81   :  { %v27_v7 = vld [vmem:[#allocation0] sm:$0x1]  ;;  %v32_v8 = vld [vmem:[#allocation0 + $0x8] sm:$0x1]  ;;  %v38_v9 = vld [vmem:[#allocation0 + $0x10] sm:$0x1] }
  0x82   :  { %30 = vst [vmem:[%s100_s1] sm:$0x1] %v27_v7  ;;  %56 = vst [vmem:[%s100_s1 + $0x1] sm:$0x1] %v32_v8  ;;  %v45_v10 = vld [vmem:[#allocation0 + $0x18] sm:$0x1] }
  0x83   :  { %57 = vst [vmem:[%s100_s1 + $0x2] sm:$0x1] %v38_v9  ;;  %58 = vst [vmem:[%s100_s1 + $0x3] sm:$0x1] %v45_v10 }

// kernel: generator_forward.5
= control target key start
LH: loop header
LB: loop body
LE: loop exit
PB: predicated region body
PF: predicated region fallthrough
CT: control target
= control target key end

     0   :  { %s733_s15 = smov 0   ;;  %s735_s16 = smov 0   ;;  %s807_s0 = inlined_call_operand.vmem [shape: bf16[8,64], index: 0, kind: input, shape index: {}]   ;;  %s808_s1 = inlined_call_operand.vmem [shape: bf16[64,512], index: 1, kind: input, shape index: {}]   ;;  %s809_s2 = inlined_call_operand.vmem [shape: f32[1,512], index: 2, kind: input, shape index: {}]   ;;  %s810_s3 = inlined_call_operand.vmem [shape: f32[1,512], index: 3, kind: input, shape index: {}]   ;;  %s811_s4 = inlined_call_operand.vmem [shape: f32[8,512], index: 4, kind: output, shape index: {}]  }
   0x1   :  { %s737_s17 = smov 0   ;;  %s739_s18 = smov 0  }
   0x2   :  { %s741_s19 = smov 0  }
   0x3 LB: > { %s23_s20 = sadd.s32 1, %s701_s18  ;;  %p66_p1 = scmp.ne.s32.totalorder %s693_s16, %s689_s15  ;;  %s705_s19 = sphi %s741_s19, %s14_s19   ;;  %s701_s18 = sphi %s739_s18, %s815_s18   ;;  %s697_s17 = sphi %s737_s17, %s814_s17   ;;  %s693_s16 = sphi %s735_s16, %s813_s16   ;;  %s689_s15 = sphi %s733_s15, %s812_s15  }
   0x4   : > { %p24_p0 = scmp.ge.s32.totalorder %s23_s20, 2  ;;  %p67_p2 = scmp.eq.s32.totalorder %s705_s19, 0 }
   0x5   : > { %s59_s22 = sadd.s32 1, %s693_s16  ;;  %p592_p5 = scmp.ge.s32.totalorder %s705_s19, 2 }
   0x6   : > { %s817_s20 = smov (%p24_p0, %s23_s20), 0  ;;  %p68_p3 = por %p67_p2, %p66_p1 }
   0x7   : > { %s56_s21 = ssub.s32 %s701_s18, %s817_s20  ;;  %179 = sbr.rel (%p592_p5) target bundleno = 20 (0x14), region = 20 }
   0x8   : > { %p57_p4 = scmp.eq.s32.totalorder %s56_s21, 0 }
   0xa   : > { %s768_s23 = scalar_select %p57_p4, %s693_s16, %s59_s22  }
   0xc   : > { %182 = sbr.rel (!%p68_p3) target bundleno = 20 (0x14), region = 24  ;;  %s184_s24 = sand.u32 (%p68_p3), 1, %s693_s16  }
   0xd   : > { %s613_s25 = sshll.u32 (%p68_p3), %s701_s18, 3  ;;  %s593_s26 = sshll.u32 (%p68_p3), %s184_s24, 6 }
   0xe   : > { %s189_s29 = scalar_lea.vmem (%p68_p3), %s808_s1, %s613_s25  ;;  %s186_s30 = scalar_lea.vmem (%p68_p3), [#allocation2], %s593_s26 }
   0xf   : > { %v232_v0 = vld [vmem:[%s189_s29] sm:$0xff] (%p68_p3)  ;;  %v234_v1 = vld [vmem:[%s189_s29 + $0x10] sm:$0xff] (%p68_p3) }
  0x10   : > { %v236_v2 = vld [vmem:[%s189_s29 + $0x20] sm:$0xff] (%p68_p3)  ;;  %233 = vst [vmem:[%s186_s30] sm:$0xff] (%p68_p3), %v232_v0  ;;  %235 = vst [vmem:[%s186_s30 + $0x8] sm:$0xff] (%p68_p3), %v234_v1  ;;  %v238_v3 = vld [vmem:[%s189_s29 + $0x30] sm:$0xff] (%p68_p3) }
  0x11   : > { %237 = vst [vmem:[%s186_s30 + $0x10] sm:$0xff] %v236_v2  ;;  %v240_v4 = vld [vmem:[%s189_s29 + $0x40] sm:$0xff]  ;;  %v242_v5 = vld [vmem:[%s189_s29 + $0x50] sm:$0xff]  ;;  %239 = vst [vmem:[%s186_s30 + $0x18] sm:$0xff] %v238_v3 }
  0x12   : > { %241 = vst [vmem:[%s186_s30 + $0x20] sm:$0xff] %v240_v4  ;;  %243 = vst [vmem:[%s186_s30 + $0x28] sm:$0xff] %v242_v5  ;;  %v244_v6 = vld [vmem:[%s189_s29 + $0x60] sm:$0xff]  ;;  %v246_v7 = vld [vmem:[%s189_s29 + $0x70] sm:$0xff] }
  0x13   : > { %245 = vst [vmem:[%s186_s30 + $0x30] sm:$0xff] %v244_v6  ;;  %247 = vst [vmem:[%s186_s30 + $0x38] sm:$0xff] %v246_v7 }
  0x14 PF: > { %p596_p6 = scmp.ge.s32.totalorder %s705_s19, 1  ;;  %p268_p7 = scmp.lt.s32.totalorder %s705_s19, 3 }
  0x16   : > { %p269_p8 = pnand %p596_p6, %p268_p7 }
  0x17   : > { %s275_s5 = sand.u32 (!%p269_p8), 1, %s689_s15   ;;  %s598_s10 = sshll.u32 (!%p269_p8), %s697_s17, 1 }
  0x18   : > { %272 = sbr.rel (%p269_p8) target bundleno = 248 (0xf8), region = 70  ;;  %s597_s6 = sshll.u32 (!%p269_p8), %s275_s5, 6 }
  0x19   : > { %s277_s7 = scalar_lea.vmem (!%p269_p8), [#allocation2], %s597_s6  ;;  %p322_p9 = scmp.lt.s32.totalorder (!%p269_p8), %s598_s10, 3 }
  0x1d   : > { %v707_v8 = vmov 0   ;;  %v655_v9 = vld [vmem:[%s277_s7 + $0x34] ss:$8 sps:$4 sm:$0xff]   ;;  %v657_v10 = vld [vmem:[%s277_s7 + $0x30] ss:$8 sps:$4 sm:$0xff]   ;;  %vm391_vm0 = vcmask 523264   ;;  %v438_v18 = vlaneseq }
  0x1e   : > { %427 = vmatprep.mubr.bf16.mxu0 %v707_v8  ;;  %403 = vmatprep.subr.bf16.mxu0 %v655_v9  ;;  %v658_v11 = vld [vmem:[%s277_s7 + $0x24] ss:$8 sps:$4 sm:$0xff]   ;;  %v660_v12 = vld [vmem:[%s277_s7 + $0x20] ss:$8 sps:$4 sm:$0xff]   ;;  %v661_v13 = vld [vmem:[%s277_s7 + $0x14] ss:$8 sps:$4 sm:$0xff]  }
  0x1f   : > { %404 = vmatpush1.bf16.msra.mxu0 %v657_v10  ;;  %v663_v14 = vld [vmem:[%s277_s7 + $0x10] ss:$8 sps:$4 sm:$0xff]   ;;  %v664_v15 = vld [vmem:[%s277_s7 + $0x4] ss:$8 sps:$4 sm:$0xff]   ;;  %v666_v16 = vld [vmem:[%s277_s7] ss:$8 sps:$4 sm:$0xff]  }
  0x20   : > { %405 = vmatprep.subr.bf16.mxu0 %v658_v11  ;;  %v342_v17 = vld [vmem:[%s807_s0] sm:$0xf]  ;;  %s819_s10 = smov (!%p322_p9, %s598_s10), 3  ;;  %v439_v19 = vshrl.u32 %v438_v18, 7 }
  0x21   : > { %s324_s13 = scalar_lea.vmem %s809_s2, %s819_s10  ;;  %s329_s21 = scalar_lea.vmem %s810_s3, %s819_s10 }
  0x22   : > { %v440_v20 = vsub.s32 0, %v439_v19  ;;  %v436_v21 = vld [vmem:[%s324_s13] sm:$0x3]  ;;  %v444_v22 = vsub.s32 1, %v439_v19  ;;  %s601_s17 = sshll.u32 %s819_s10, 3 }
  0x23   : > { %406 = vmatpush1.bf16.msra.mxu0 %v660_v12  ;;  %v450_v23 = vld [vmem:[%s329_s21] sm:$0x3]  ;;  %s339_s25 = scalar_lea.vmem %s811_s4, %s601_s17 }
  0x24   : > { %407 = vmatprep.subr.bf16.mxu0 %v661_v13  ;;  %v441_v24 = vrot.slane %v436_v21, %v440_v20  ;;  %v455_v25 = vrot.slane %v450_v23, %v440_v20  ;;  %v445_v26 = vrot.slane %v436_v21, %v444_v22  ;;  %v459_v29 = vrot.slane %v450_v23, %v444_v22 }
  0x27   : > { %408 = vmatpush1.bf16.msra.mxu0 %v663_v14 }
  0x28   : > { %409 = vmatprep.subr.bf16.mxu0 %v664_v15 }
  0x2b   : > { %410 = vmatpush1.bf16.msra.mxu0 %v666_v16 }
  0x2e   : > { %610 = vmatmul.mubr.msk.bf16.vlgmr.msra.gmra.mxu0 %vm391_vm0, %v342_v17 }
  0xee   : > { %v429_v27 = vpop.f32.mrf.mxu0 }
  0xef   : > { %v448_v28 = vmul.f32 %v441_v24, %v429_v27 }
  0xf0   : > { %v431_v30 = vpop.f32.mrf.mxu0 }
  0xf1   : > { %v462_v31 = vadd.f32 %v455_v25, %v448_v28  ;;  %v449_v32 = vmul.f32 %v445_v26, %v431_v30 }
  0xf2   : > { %v433_v33 = vpop.f32.mrf.mxu0 }
  0xf3   : > { %v464_v34 = vmax.f32 %v462_v31, 0.0  ;;  %v463_v35 = vadd.f32 %v459_v29, %v449_v32 }
  0xf4   : > { %v434_v36 = vpop.f32.mrf.mxu0 }
  0xf5   : > { %466 = vst [vmem:[%s339_s25] sm:$0xff] %v464_v34  ;;  %v465_v37 = vmax.f32 %v463_v35, 0.0 }
  0xf7   : > { %467 = vst [vmem:[%s339_s25 + $0x8] sm:$0xff] %v465_v37 }
  0xf8 PF: > { %s14_s19 = sadd.s32 1, %s705_s19   ;;  %s812_s15 = smov %s693_s16 }
  0xf9   : > { %p11_p10 = scmp.ge.s32.totalorder %s14_s19, 4   ;;  %s813_s16 = smov %s768_s23 }
  0xfa   : > { %s814_s17 = smov %s701_s18  ;;  %s815_s18 = smov %s817_s20 }
  0xfb   :  { %13 = sbr.rel (!%p11_p10) target bundleno = 3 (0x3), region = 118 }

// kernel: generator_forward.6
= control target key start
LH: loop header
LB: loop body
LE: loop exit
PB: predicated region body
PF: predicated region fallthrough
CT: control target
= control target key end

     0   :  { %vm200_vm0 = vcmask 261120   ;;  %s548_s1 = inlined_call_operand.vmem [shape: bf16[288,128], index: 1, kind: input, shape index: {}]   ;;  %s549_s0 = inlined_call_operand.vmem [shape: bf16[32,288], index: 0, kind: input, shape index: {}]   ;;  %s550_s2 = inlined_call_operand.vmem [shape: f32[1,128], index: 2, kind: input, shape index: {}]   ;;  %s551_s3 = inlined_call_operand.vmem [shape: f32[1,128], index: 3, kind: input, shape index: {}]   ;;  %s552_s4 = inlined_call_operand.vmem [shape: f32[32,128], index: 4, kind: output, shape index: {}]  }
   0x1   :  { %v407_v0 = vld [vmem:[%s548_s1 + $0x78] sm:$0xff]   ;;  %v409_v2 = vld [vmem:[%s548_s1 + $0x70] sm:$0xff]   ;;  %v411_v4 = vld [vmem:[%s548_s1 + $0x68] sm:$0xff]  }
   0x2   :  { %v408_v1 = vld [vmem:[%s548_s1 + $0x38] sm:$0xff]   ;;  %367 = vmatprep.subr.bf16.mxu0 %v407_v0  ;;  %v410_v3 = vld [vmem:[%s548_s1 + $0x30] sm:$0xff]   ;;  %v412_v5 = vld [vmem:[%s548_s1 + $0x28] sm:$0xff]  }
   0x3   :  { %368 = vmatpush3.bf16.msra.mxu0 %v408_v1  ;;  %v413_v6 = vld [vmem:[%s548_s1 + $0x60] sm:$0xff]   ;;  %v415_v8 = vld [vmem:[%s548_s1 + $0x58] sm:$0xff]   ;;  %v421_v9 = vld [vmem:[%s548_s1 + $0x88] sm:$0xff]  }
   0x4   :  { %369 = vmatprep.subr.bf16.mxu0 %v409_v2  ;;  %v414_v7 = vld [vmem:[%s548_s1 + $0x20] sm:$0xff]   ;;  %v416_v10 = vld [vmem:[%s548_s1 + $0x18] sm:$0xff]   ;;  %v417_v11 = vld [vmem:[%s548_s1 + $0x50] sm:$0xff]   ;;  %399 = vmatprep.subr.bf16.mxu1 %v421_v9 }
   0x5   :  { %v418_v12 = vld [vmem:[%s548_s1 + $0x10] sm:$0xff]   ;;  %400 = vmatpush3.bf16.msra.mxu1 %v421_v9  ;;  %v424_v13 = vld [vmem:[%s548_s1 + $0x80] sm:$0xff]   ;;  %v419_v14 = vld [vmem:[%s548_s1 + $0x48] sm:$0xff]  }
   0x6   :  { %401 = vmatprep.subr.bf16.mxu1 %v424_v13  ;;  %v427_v15 = vld [vmem:[%s549_s0 + $0x4] ss:$12 sps:$4 sm:$0xff]   ;;  %v428_v16 = vld [vmem:[%s549_s0 + $0x8] ss:$12 sps:$4 sm:$0xff]   ;;  %v429_v17 = vld [vmem:[%s549_s0 + $0x20] ss:$12 sps:$4 sm:$0xff]  }
   0x7   :  { %370 = vmatpush3.bf16.msra.mxu0 %v410_v3  ;;  %239 = vmatprep.mubr.bf16.mxu0 %v427_v15  ;;  %v420_v18 = vld [vmem:[%s548_s1 + $0x8] sm:$0xff]   ;;  %v422_v19 = vld [vmem:[%s548_s1 + $0x40] sm:$0xff]  }
   0x8   :  { %371 = vmatprep.subr.bf16.mxu0 %v411_v4  ;;  %403 = vmatprep.mubr.msk.bf16.mxu1 %vm200_vm0, %v428_v16  ;;  %v423_v20 = vld [vmem:[%s548_s1] sm:$0xff]   ;;  %v430_v22 = vld [vmem:[%s549_s0 + $0x1c] ss:$12 sps:$4 sm:$0xff]  }
   0x9   :  { %402 = vmatpush3.bf16.msra.mxu1 %v424_v13  ;;  %v425_v21 = vld [vmem:[%s549_s0] ss:$12 sps:$4 sm:$0xff]   ;;  %v432_v23 = vld [vmem:[%s549_s0 + $0x18] ss:$12 sps:$4 sm:$0xff]  }
   0xa   :  { %v365_v31 = vld [vmem:[%s550_s2] ss:$0 sm:$0xff] }
   0xb   :  { %372 = vmatpush3.bf16.msra.mxu0 %v412_v5  ;;  %v366_v33 = vld [vmem:[%s551_s3] ss:$0 sm:$0xff] }
   0xc   :  { %373 = vmatprep.subr.bf16.mxu0 %v413_v6  ;;  %404 = vmatmul.mubr.msk.bf16.vlgmr.msra.gmra.mxu1 %vm200_vm0, %v429_v17 }
   0xf   :  { %374 = vmatpush3.bf16.msra.mxu0 %v414_v7 }
  0x10   :  { %375 = vmatprep.subr.bf16.mxu0 %v415_v8 }
  0x13   :  { %376 = vmatpush3.bf16.msra.mxu0 %v416_v10 }
  0x14   :  { %377 = vmatprep.subr.bf16.mxu0 %v417_v11 }
  0x17   :  { %378 = vmatpush3.bf16.msra.mxu0 %v418_v12 }
  0x18   :  { %379 = vmatprep.subr.bf16.mxu0 %v419_v14 }
  0x1b   :  { %380 = vmatpush3.bf16.msra.mxu0 %v420_v18 }
  0x1c   :  { %381 = vmatprep.subr.bf16.mxu0 %v422_v19 }
  0x1f   :  { %382 = vmatpush3.bf16.msra.mxu0 %v423_v20 }
  0x22   :  { %240 = vmatmul.mubr.bf16.vlgmr.msra.gmra.mxu0 %v425_v21 }
  0x23   :  { %247 = vmatprep.mubr.bf16.mxu0 %v430_v22 }
  0x2a   :  { %248 = vmatmul.mubr.bf16.gmra.mxu0 %v432_v23 }
  0xcc   :  { %v405_v24 = vpop.f32.mrf.mxu1 }
  0xce   :  { %v290_v25 = vpop.f32.mrf.mxu1 }
  0xd0   :  { %v406_v28 = vpop.f32.mrf.mxu1 }
  0xd2   :  { %v293_v35 = vpop.f32.mrf.mxu1 }
  0xe2   :  { %v383_v26 = vpop.f32.mrf.mxu0 }
  0xe4   :  { %v384_v27 = vpop.f32.mrf.mxu0 }
  0xe5   :  { %v385_v29 = vadd.f32 %v384_v27, %v383_v26 }
  0xe6   :  { %v386_v30 = vpop.f32.mrf.mxu0 }
  0xe7   :  { %v291_v32 = vadd.f32 %v385_v29, %v290_v25 }
  0xe8   :  { %v387_v34 = vpop.f32.mrf.mxu0 }
  0xe9   :  { %v312_v36 = vmul.f32 %v365_v31, %v291_v32  ;;  %v388_v37 = vadd.f32 %v387_v34, %v386_v30 }
  0xea   :  { %v389_v38 = vpop.f32.mrf.mxu0 }
  0xeb   :  { %v323_v39 = vadd.f32 %v366_v33, %v312_v36  ;;  %v294_v40 = vadd.f32 %v388_v37, %v293_v35 }
  0xec   :  { %v390_v41 = vpop.f32.mrf.mxu0 }
  0xed   :  { %v327_v42 = vmax.f32 %v323_v39, 0.0  ;;  %v313_v43 = vmul.f32 %v365_v31, %v294_v40  ;;  %v391_v44 = vadd.f32 %v390_v41, %v389_v38 }
  0xee   :  { %v392_v45 = vpop.f32.mrf.mxu0 }
  0xef   :  { %331 = vst [vmem:[%s552_s4] sm:$0xff] %v327_v42  ;;  %v324_v46 = vadd.f32 %v366_v33, %v313_v43  ;;  %v299_v47 = vadd.f32 %v405_v24, %v391_v44 }
  0xf0   :  { %v393_v48 = vpop.f32.mrf.mxu0 }
  0xf1   :  { %v328_v49 = vmax.f32 %v324_v46, 0.0  ;;  %v314_v50 = vmul.f32 %v365_v31, %v299_v47  ;;  %v394_v51 = vadd.f32 %v393_v48, %v392_v45 }
  0xf3   :  { %332 = vst [vmem:[%s552_s4 + $0x8] sm:$0xff] %v328_v49  ;;  %v325_v52 = vadd.f32 %v366_v33, %v314_v50  ;;  %v302_v53 = vadd.f32 %v406_v28, %v394_v51 }
  0xf5   :  { %v329_v54 = vmax.f32 %v325_v52, 0.0  ;;  %v315_v55 = vmul.f32 %v365_v31, %v302_v53 }
  0xf7   :  { %333 = vst [vmem:[%s552_s4 + $0x10] sm:$0xff] %v329_v54  ;;  %v326_v56 = vadd.f32 %v366_v33, %v315_v55 }
  0xf9   :  { %v330_v57 = vmax.f32 %v326_v56, 0.0 }
  0xfb   :  { %334 = vst [vmem:[%s552_s4 + $0x18] sm:$0xff] %v330_v57 }

// kernel: generator_forward.7
= control target key start
LH: loop header
LB: loop body
LE: loop exit
PB: predicated region body
PF: predicated region fallthrough
CT: control target
= control target key end

     0   :  { %v469_v0 = vmov 0   ;;  %vm178_vm0 = vcmask 130048   ;;  %s668_s1 = inlined_call_operand.vmem [shape: bf16[144,128], index: 1, kind: input, shape index: {}]   ;;  %s669_s0 = inlined_call_operand.vmem [shape: bf16[128,144], index: 0, kind: input, shape index: {}]   ;;  %s670_s2 = inlined_call_operand.vmem [shape: f32[1,128], index: 2, kind: input, shape index: {}]   ;;  %s671_s3 = inlined_call_operand.vmem [shape: f32[1,128], index: 3, kind: input, shape index: {}]   ;;  %s672_s4 = inlined_call_operand.vmem [shape: f32[128,128], index: 4, kind: output, shape index: {}]  }
   0x1   :  { %203 = vmatprep.subr.bf16.mxu0 %v469_v0  ;;  %417 = vmatprep.subr.bf16.mxu1 %v469_v0  ;;  %v436_v1 = vld [vmem:[%s668_s1 + $0x38] sm:$0xff]   ;;  %v437_v2 = vld [vmem:[%s668_s1 + $0x30] sm:$0xff]   ;;  %v438_v3 = vld [vmem:[%s668_s1 + $0x28] sm:$0xff]  }
   0x2   :  { %204 = vmatpush1.bf16.msra.mxu0 %v436_v1  ;;  %426 = vmatpush1.bf16.msra.mxu1 %v436_v1  ;;  %v439_v4 = vld [vmem:[%s668_s1 + $0x20] sm:$0xff]   ;;  %v440_v7 = vld [vmem:[%s668_s1 + $0x18] sm:$0xff]   ;;  %v441_v8 = vld [vmem:[%s668_s1 + $0x10] sm:$0xff]  }
   0x3   :  { %205 = vmatprep.subr.bf16.mxu0 %v469_v0  ;;  %418 = vmatprep.subr.bf16.mxu1 %v469_v0  ;;  %v447_v5 = vld [vmem:[%s669_s0 + $0x4] ss:$8 sps:$4 sm:$0xff]   ;;  %v445_v12 = vld [vmem:[%s669_s0] ss:$8 sps:$4 sm:$0xff]   ;;  %v451_v14 = vld [vmem:[%s669_s0 + $0x14] ss:$8 sps:$4 sm:$0xff]  }
   0x4   :  { %v450_v6 = vld [vmem:[%s669_s0 + $0x44] ss:$8 sps:$4 sm:$0xff]   ;;  %407 = vmatprep.mubr.msk.bf16.mxu0 %vm178_vm0, %v447_v5  ;;  %v448_v13 = vld [vmem:[%s669_s0 + $0x40] ss:$8 sps:$4 sm:$0xff]   ;;  %v453_v15 = vld [vmem:[%s669_s0 + $0x54] ss:$8 sps:$4 sm:$0xff]  }
   0x5   :  { %411 = vmatprep.mubr.msk.bf16.mxu1 %vm178_vm0, %v450_v6  ;;  %v442_v9 = vld [vmem:[%s668_s1 + $0x8] sm:$0xff]   ;;  %v443_v10 = vld [vmem:[%s668_s1] sm:$0xff]   ;;  %v455_v16 = vld [vmem:[%s669_s0 + $0x10] ss:$8 sps:$4 sm:$0xff]  }
   0x6   :  { %206 = vmatpush1.bf16.msra.mxu0 %v437_v2  ;;  %427 = vmatpush1.bf16.msra.mxu1 %v437_v2  ;;  %v444_v11 = vld [vmem:[%s668_s1 + $0x40] sm:$0xff]   ;;  %v456_v17 = vld [vmem:[%s669_s0 + $0x50] ss:$8 sps:$4 sm:$0xff]   ;;  %v463_v22 = vld [vmem:[%s669_s0 + $0x34] ss:$8 sps:$4 sm:$0xff]  }
   0x7   :  { %207 = vmatprep.subr.bf16.mxu0 %v469_v0  ;;  %419 = vmatprep.subr.bf16.mxu1 %v469_v0  ;;  %v457_v18 = vld [vmem:[%s669_s0 + $0x24] ss:$8 sps:$4 sm:$0xff]   ;;  %v461_v20 = vld [vmem:[%s669_s0 + $0x20] ss:$8 sps:$4 sm:$0xff]   ;;  %v465_v23 = vld [vmem:[%s669_s0 + $0x74] ss:$8 sps:$4 sm:$0xff]  }
   0x8   :  { %v459_v19 = vld [vmem:[%s669_s0 + $0x64] ss:$8 sps:$4 sm:$0xff]   ;;  %v462_v21 = vld [vmem:[%s669_s0 + $0x60] ss:$8 sps:$4 sm:$0xff]   ;;  %v467_v24 = vld [vmem:[%s669_s0 + $0x30] ss:$8 sps:$4 sm:$0xff]  }
   0x9   :  { %v468_v25 = vld [vmem:[%s669_s0 + $0x70] ss:$8 sps:$4 sm:$0xff]   ;;  %v581_v26 = vld [vmem:[%s670_s2] ss:$0 sm:$0xff] }
   0xa   :  { %208 = vmatpush1.bf16.msra.mxu0 %v438_v3  ;;  %428 = vmatpush1.bf16.msra.mxu1 %v438_v3  ;;  %v586_v28 = vld [vmem:[%s671_s3] ss:$0 sm:$0xff] }
   0xb   :  { %209 = vmatprep.subr.bf16.mxu0 %v469_v0  ;;  %420 = vmatprep.subr.bf16.mxu1 %v469_v0 }
   0xe   :  { %210 = vmatpush1.bf16.msra.mxu0 %v439_v4  ;;  %429 = vmatpush1.bf16.msra.mxu1 %v439_v4 }
   0xf   :  { %211 = vmatprep.subr.bf16.mxu0 %v469_v0  ;;  %421 = vmatprep.subr.bf16.mxu1 %v469_v0 }
  0x12   :  { %212 = vmatpush1.bf16.msra.mxu0 %v440_v7  ;;  %430 = vmatpush1.bf16.msra.mxu1 %v440_v7 }
  0x13   :  { %213 = vmatprep.subr.bf16.mxu0 %v469_v0  ;;  %422 = vmatprep.subr.bf16.mxu1 %v469_v0 }
  0x16   :  { %214 = vmatpush1.bf16.msra.mxu0 %v441_v8  ;;  %431 = vmatpush1.bf16.msra.mxu1 %v441_v8 }
  0x17   :  { %215 = vmatprep.subr.bf16.mxu0 %v469_v0  ;;  %423 = vmatprep.subr.bf16.mxu1 %v469_v0 }
  0x1a   :  { %216 = vmatpush1.bf16.msra.mxu0 %v442_v9  ;;  %432 = vmatpush1.bf16.msra.mxu1 %v442_v9 }
  0x1b   :  { %217 = vmatprep.subr.bf16.mxu0 %v469_v0  ;;  %424 = vmatprep.subr.bf16.mxu1 %v469_v0 }
  0x1e   :  { %218 = vmatpush1.bf16.msra.mxu0 %v443_v10  ;;  %433 = vmatpush1.bf16.msra.mxu1 %v443_v10 }
  0x1f   :  { %233 = vmatprep.subr.bf16.mxu0 %v469_v0  ;;  %425 = vmatprep.subr.bf16.mxu1 %v469_v0 }
  0x22   :  { %234 = vmatpush2.bf16.msra.mxu0 %v444_v11  ;;  %434 = vmatpush2.bf16.msra.mxu1 %v444_v11 }
  0x25   :  { %236 = vmatmul.mubr.bf16.vlgmr.msra.gmra.mxu0 %v445_v12  ;;  %268 = vmatmul.mubr.bf16.vlgmr.msra.gmra.mxu1 %v448_v13 }
  0x26   :  { %408 = vmatprep.mubr.msk.bf16.mxu0 %vm178_vm0, %v451_v14  ;;  %412 = vmatprep.mubr.msk.bf16.mxu1 %vm178_vm0, %v453_v15 }
  0x2d   :  { %244 = vmatmul.mubr.bf16.gmra.mxu0 %v455_v16  ;;  %276 = vmatmul.mubr.bf16.gmra.mxu1 %v456_v17 }
  0x2e   :  { %409 = vmatprep.mubr.msk.bf16.mxu0 %vm178_vm0, %v457_v18  ;;  %413 = vmatprep.mubr.msk.bf16.mxu1 %vm178_vm0, %v459_v19 }
  0x35   :  { %252 = vmatmul.mubr.bf16.gmra.mxu0 %v461_v20  ;;  %284 = vmatmul.mubr.bf16.gmra.mxu1 %v462_v21 }
  0x36   :  { %410 = vmatprep.mubr.msk.bf16.mxu0 %vm178_vm0, %v463_v22  ;;  %414 = vmatprep.mubr.msk.bf16.mxu1 %vm178_vm0, %v465_v23 }
  0x3d   :  { %260 = vmatmul.mubr.bf16.gmra.mxu0 %v467_v24  ;;  %292 = vmatmul.mubr.bf16.gmra.mxu1 %v468_v25 }
  0xe5   :  { %v237_v27 = vpop.f32.mrf.mxu0  ;;  %v269_v29 = vpop.f32.mrf.mxu1 }
  0xe6   :  { %v307_v30 = vmul.f32 %v581_v26, %v237_v27  ;;  %v315_v31 = vmul.f32 %v581_v26, %v269_v29 }
  0xe7   :  { %v239_v32 = vpop.f32.mrf.mxu0  ;;  %v271_v33 = vpop.f32.mrf.mxu1 }
  0xe8   :  { %v330_v34 = vadd.f32 %v586_v28, %v307_v30  ;;  %v338_v35 = vadd.f32 %v586_v28, %v315_v31 }
  0xe9   :  { %v240_v36 = vpop.f32.mrf.mxu0  ;;  %v272_v37 = vpop.f32.mrf.mxu1 }
  0xea   :  { %v346_v38 = vmax.f32 %v330_v34, 0.0  ;;  %v354_v39 = vmax.f32 %v338_v35, 0.0  ;;  %v308_v40 = vmul.f32 %v581_v26, %v240_v36  ;;  %v316_v41 = vmul.f32 %v581_v26, %v272_v37 }
  0xeb   :  { %v242_v42 = vpop.f32.mrf.mxu0  ;;  %v274_v43 = vpop.f32.mrf.mxu1 }
  0xec   :  { %362 = vst [vmem:[%s672_s4] sm:$0xff] %v346_v38  ;;  %370 = vst [vmem:[%s672_s4 + $0x40] sm:$0xff] %v354_v39  ;;  %v331_v44 = vadd.f32 %v586_v28, %v308_v40  ;;  %v339_v45 = vadd.f32 %v586_v28, %v316_v41 }
  0xed   :  { %v245_v46 = vpop.f32.mrf.mxu0  ;;  %v277_v47 = vpop.f32.mrf.mxu1 }
  0xee   :  { %v347_v48 = vmax.f32 %v331_v44, 0.0  ;;  %v355_v49 = vmax.f32 %v339_v45, 0.0  ;;  %v309_v50 = vmul.f32 %v581_v26, %v245_v46  ;;  %v317_v51 = vmul.f32 %v581_v26, %v277_v47 }
  0xef   :  { %v247_v52 = vpop.f32.mrf.mxu0  ;;  %v279_v53 = vpop.f32.mrf.mxu1 }
  0xf0   :  { %363 = vst [vmem:[%s672_s4 + $0x8] sm:$0xff] %v347_v48  ;;  %371 = vst [vmem:[%s672_s4 + $0x48] sm:$0xff] %v355_v49  ;;  %v332_v54 = vadd.f32 %v586_v28, %v309_v50  ;;  %v340_v55 = vadd.f32 %v586_v28, %v317_v51 }
  0xf1   :  { %v248_v56 = vpop.f32.mrf.mxu0  ;;  %v280_v57 = vpop.f32.mrf.mxu1 }
  0xf2   :  { %v348_v58 = vmax.f32 %v332_v54, 0.0  ;;  %v356_v59 = vmax.f32 %v340_v55, 0.0  ;;  %v310_v60 = vmul.f32 %v581_v26, %v248_v56  ;;  %v318_v61 = vmul.f32 %v581_v26, %v280_v57 }
  0xf3   :  { %v250_v62 = vpop.f32.mrf.mxu0  ;;  %v282_v63 = vpop.f32.mrf.mxu1 }
  0xf4   :  { %364 = vst [vmem:[%s672_s4 + $0x10] sm:$0xff] %v348_v58  ;;  %372 = vst [vmem:[%s672_s4 + $0x50] sm:$0xff] %v356_v59  ;;  %v333_v0 = vadd.f32 %v586_v28, %v310_v60  ;;  %v341_v1 = vadd.f32 %v586_v28, %v318_v61 }
  0xf5   :  { %v253_v2 = vpop.f32.mrf.mxu0  ;;  %v285_v3 = vpop.f32.mrf.mxu1 }
  0xf6   :  { %v349_v4 = vmax.f32 %v333_v0, 0.0  ;;  %v357_v5 = vmax.f32 %v341_v1, 0.0  ;;  %v311_v6 = vmul.f32 %v581_v26, %v253_v2  ;;  %v319_v7 = vmul.f32 %v581_v26, %v285_v3 }
  0xf7   :  { %v255_v8 = vpop.f32.mrf.mxu0  ;;  %v287_v9 = vpop.f32.mrf.mxu1 }
  0xf8   :  { %365 = vst [vmem:[%s672_s4 + $0x18] sm:$0xff] %v349_v4  ;;  %373 = vst [vmem:[%s672_s4 + $0x58] sm:$0xff] %v357_v5  ;;  %v334_v10 = vadd.f32 %v586_v28, %v311_v6  ;;  %v342_v11 = vadd.f32 %v586_v28, %v319_v7 }
  0xf9   :  { %v256_v12 = vpop.f32.mrf.mxu0  ;;  %v288_v13 = vpop.f32.mrf.mxu1 }
  0xfa   :  { %v350_v14 = vmax.f32 %v334_v10, 0.0  ;;  %v358_v15 = vmax.f32 %v342_v11, 0.0  ;;  %v312_v16 = vmul.f32 %v581_v26, %v256_v12  ;;  %v320_v17 = vmul.f32 %v581_v26, %v288_v13 }
  0xfb   :  { %v258_v18 = vpop.f32.mrf.mxu0  ;;  %v290_v19 = vpop.f32.mrf.mxu1 }
  0xfc   :  { %366 = vst [vmem:[%s672_s4 + $0x20] sm:$0xff] %v350_v14  ;;  %374 = vst [vmem:[%s672_s4 + $0x60] sm:$0xff] %v358_v15  ;;  %v335_v20 = vadd.f32 %v586_v28, %v312_v16  ;;  %v343_v21 = vadd.f32 %v586_v28, %v320_v17 }
  0xfd   :  { %v261_v22 = vpop.f32.mrf.mxu0  ;;  %v293_v23 = vpop.f32.mrf.mxu1 }
  0xfe   :  { %v351_v24 = vmax.f32 %v335_v20, 0.0  ;;  %v359_v25 = vmax.f32 %v343_v21, 0.0  ;;  %v313_v27 = vmul.f32 %v581_v26, %v261_v22  ;;  %v321_v29 = vmul.f32 %v581_v26, %v293_v23 }
  0xff   :  { %v263_v30 = vpop.f32.mrf.mxu0  ;;  %v295_v31 = vpop.f32.mrf.mxu1 }
 0x100   :  { %367 = vst [vmem:[%s672_s4 + $0x28] sm:$0xff] %v351_v24  ;;  %375 = vst [vmem:[%s672_s4 + $0x68] sm:$0xff] %v359_v25  ;;  %v336_v32 = vadd.f32 %v586_v28, %v313_v27  ;;  %v344_v33 = vadd.f32 %v586_v28, %v321_v29 }
 0x101   :  { %v264_v34 = vpop.f32.mrf.mxu0  ;;  %v296_v35 = vpop.f32.mrf.mxu1 }
 0x102   :  { %v352_v36 = vmax.f32 %v336_v32, 0.0  ;;  %v360_v37 = vmax.f32 %v344_v33, 0.0  ;;  %v314_v38 = vmul.f32 %v581_v26, %v264_v34  ;;  %v322_v39 = vmul.f32 %v581_v26, %v296_v35 }
 0x103   :  { %v266_v40 = vpop.f32.mrf.mxu0  ;;  %v298_v41 = vpop.f32.mrf.mxu1 }
 0x104   :  { %368 = vst [vmem:[%s672_s4 + $0x30] sm:$0xff] %v352_v36  ;;  %376 = vst [vmem:[%s672_s4 + $0x70] sm:$0xff] %v360_v37  ;;  %v337_v42 = vadd.f32 %v586_v28, %v314_v38  ;;  %v345_v43 = vadd.f32 %v586_v28, %v322_v39 }
 0x106   :  { %v353_v44 = vmax.f32 %v337_v42, 0.0  ;;  %v361_v45 = vmax.f32 %v345_v43, 0.0 }
 0x108   :  { %369 = vst [vmem:[%s672_s4 + $0x38] sm:$0xff] %v353_v44  ;;  %377 = vst [vmem:[%s672_s4 + $0x78] sm:$0xff] %v361_v45 }

// kernel: generator_forward.8
= control target key start
LH: loop header
LB: loop body
LE: loop exit
PB: predicated region body
PF: predicated region fallthrough
CT: control target
= control target key end

     0   :  { %vm375_vm0 = vcmask 1043456   ;;  %vm278_vm1 = vcmask 588800   ;;  %s1671_s1 = inlined_call_operand.vmem [shape: bf16[72,128], index: 1, kind: input, shape index: {}]   ;;  %s1672_s0 = inlined_call_operand.vmem [shape: bf16[512,72], index: 0, kind: input, shape index: {}]   ;;  %s1673_s2 = inlined_call_operand.vmem [shape: f32[1,128], index: 2, kind: input, shape index: {}]   ;;  %s1674_s3 = inlined_call_operand.vmem [shape: f32[1,128], index: 3, kind: input, shape index: {}]   ;;  %s1675_s4 = inlined_call_operand.vmem [shape: f32[512,128], index: 4, kind: output, shape index: {}]  }
   0x1   :  { %v1136_v0 = vld [vmem:[%s1671_s1 + $0x20] ss:$0 sps:$4 sm:$0xff]   ;;  %v1137_v1 = vld [vmem:[%s1671_s1 + $0x18] sm:$0xff]   ;;  %v1138_v3 = vld [vmem:[%s1671_s1 + $0x10] sm:$0xff]  }
   0x2   :  { %1134 = vmatprep.subr.msk.bf16.mxu0 %vm375_vm0, %v1136_v0  ;;  %1135 = vmatprep.subr.msk.bf16.mxu1 %vm375_vm0, %v1136_v0  ;;  %v377_v2 = vsel %vm375_vm0, %v1136_v0, 0  ;;  %v1141_v4 = vld [vmem:[%s1672_s0] sm:$0xff]   ;;  %v1139_v6 = vld [vmem:[%s1671_s1 + $0x8] sm:$0xff]   ;;  %v1145_v10 = vld [vmem:[%s1672_s0 + $0x10] sm:$0xff]  }
   0x3   :  { %1051 = vmatpush3.bf16.msra.mxu0 %v377_v2  ;;  %1129 = vmatpush3.bf16.msra.mxu1 %v377_v2  ;;  %v1142_v5 = vld [vmem:[%s1672_s0 + $0x80] sm:$0xff]   ;;  %v1143_v8 = vld [vmem:[%s1672_s0 + $0x8] sm:$0xff]   ;;  %v1146_v11 = vld [vmem:[%s1672_s0 + $0x90] sm:$0xff]  }
   0x4   :  { %1052 = vmatprep.subr.bf16.mxu0 %v1137_v1  ;;  %1125 = vmatprep.subr.bf16.mxu1 %v1137_v1  ;;  %v1140_v7 = vld [vmem:[%s1671_s1] sm:$0xff]   ;;  %v1144_v9 = vld [vmem:[%s1672_s0 + $0x88] sm:$0xff]   ;;  %v1147_v12 = vld [vmem:[%s1672_s0 + $0x18] sm:$0xff]  }
   0x5   :  { %1060 = vmatprep.mubr.msk.bf16.mxu0 %vm278_vm1, %v1141_v4  ;;  %1092 = vmatprep.mubr.msk.bf16.mxu1 %vm278_vm1, %v1142_v5  ;;  %v1148_v13 = vld [vmem:[%s1672_s0 + $0x98] sm:$0xff]   ;;  %v1149_v14 = vld [vmem:[%s1672_s0 + $0x20] sm:$0xff]   ;;  %v1151_v16 = vld [vmem:[%s1672_s0 + $0x28] sm:$0xff]  }
   0x6   :  { %v1150_v15 = vld [vmem:[%s1672_s0 + $0xa0] sm:$0xff]   ;;  %v1152_v17 = vld [vmem:[%s1672_s0 + $0xa8] sm:$0xff]   ;;  %v1153_v18 = vld [vmem:[%s1672_s0 + $0x30] sm:$0xff]  }
   0x7   :  { %1053 = vmatpush3.bf16.msra.mxu0 %v1137_v1  ;;  %1130 = vmatpush3.bf16.msra.mxu1 %v1137_v1  ;;  %v1154_v19 = vld [vmem:[%s1672_s0 + $0xb0] sm:$0xff]   ;;  %v1155_v20 = vld [vmem:[%s1672_s0 + $0x38] sm:$0xff]   ;;  %v1157_v22 = vld [vmem:[%s1672_s0 + $0x40] sm:$0xff]  }
   0x8   :  { %1054 = vmatprep.subr.bf16.mxu0 %v1138_v3  ;;  %1126 = vmatprep.subr.bf16.mxu1 %v1138_v3  ;;  %v1156_v21 = vld [vmem:[%s1672_s0 + $0xb8] sm:$0xff]   ;;  %v1158_v23 = vld [vmem:[%s1672_s0 + $0xc0] sm:$0xff]   ;;  %v1159_v24 = vld [vmem:[%s1672_s0 + $0x48] sm:$0xff]  }
   0x9   :  { %v1160_v25 = vld [vmem:[%s1672_s0 + $0xc8] sm:$0xff]   ;;  %v1161_v26 = vld [vmem:[%s1672_s0 + $0x50] sm:$0xff]   ;;  %v1163_v28 = vld [vmem:[%s1672_s0 + $0x58] sm:$0xff]  }
   0xa   :  { %v1162_v27 = vld [vmem:[%s1672_s0 + $0xd0] sm:$0xff]   ;;  %v1164_v29 = vld [vmem:[%s1672_s0 + $0xd8] sm:$0xff]   ;;  %v1165_v30 = vld [vmem:[%s1672_s0 + $0x60] sm:$0xff]  }
   0xb   :  { %1055 = vmatpush3.bf16.msra.mxu0 %v1138_v3  ;;  %1131 = vmatpush3.bf16.msra.mxu1 %v1138_v3  ;;  %v1166_v31 = vld [vmem:[%s1672_s0 + $0xe0] sm:$0xff]   ;;  %v1167_v32 = vld [vmem:[%s1672_s0 + $0x68] sm:$0xff]   ;;  %v1169_v34 = vld [vmem:[%s1672_s0 + $0x70] sm:$0xff]  }
   0xc   :  { %1056 = vmatprep.subr.bf16.mxu0 %v1139_v6  ;;  %1127 = vmatprep.subr.bf16.mxu1 %v1139_v6  ;;  %v1168_v33 = vld [vmem:[%s1672_s0 + $0xe8] sm:$0xff]   ;;  %v1170_v35 = vld [vmem:[%s1672_s0 + $0xf0] sm:$0xff]   ;;  %v1171_v36 = vld [vmem:[%s1672_s0 + $0x78] sm:$0xff]  }
   0xd   :  { %v1172_v37 = vld [vmem:[%s1672_s0 + $0xf8] sm:$0xff]   ;;  %v1344_v38 = vld [vmem:[%s1673_s2] ss:$0 sm:$0xff] }
   0xe   :  { %v1349_v40 = vld [vmem:[%s1674_s3] ss:$0 sm:$0xff] }
   0xf   :  { %1057 = vmatpush3.bf16.msra.mxu0 %v1139_v6  ;;  %1132 = vmatpush3.bf16.msra.mxu1 %v1139_v6 }
  0x10   :  { %1058 = vmatprep.subr.bf16.mxu0 %v1140_v7  ;;  %1128 = vmatprep.subr.bf16.mxu1 %v1140_v7 }
  0x13   :  { %1059 = vmatpush3.bf16.msra.mxu0 %v1140_v7  ;;  %1133 = vmatpush3.bf16.msra.mxu1 %v1140_v7 }
  0x16   :  { %1061 = vmatmul.mubr.msk.bf16.vlgmr.msra.gmra.mxu0 %vm278_vm1, %v1143_v8  ;;  %1093 = vmatmul.mubr.msk.bf16.vlgmr.msra.gmra.mxu1 %vm278_vm1, %v1144_v9 }
  0x17   :  { %1064 = vmatprep.mubr.msk.bf16.mxu0 %vm278_vm1, %v1145_v10  ;;  %1096 = vmatprep.mubr.msk.bf16.mxu1 %vm278_vm1, %v1146_v11 }
  0x1e   :  { %1065 = vmatmul.mubr.msk.bf16.gmra.mxu0 %vm278_vm1, %v1147_v12  ;;  %1097 = vmatmul.mubr.msk.bf16.gmra.mxu1 %vm278_vm1, %v1148_v13 }
  0x1f   :  { %1068 = vmatprep.mubr.msk.bf16.mxu0 %vm278_vm1, %v1149_v14  ;;  %1100 = vmatprep.mubr.msk.bf16.mxu1 %vm278_vm1, %v1150_v15 }
  0x26   :  { %1069 = vmatmul.mubr.msk.bf16.gmra.mxu0 %vm278_vm1, %v1151_v16  ;;  %1101 = vmatmul.mubr.msk.bf16.gmra.mxu1 %vm278_vm1, %v1152_v17 }
  0x27   :  { %1072 = vmatprep.mubr.msk.bf16.mxu0 %vm278_vm1, %v1153_v18  ;;  %1104 = vmatprep.mubr.msk.bf16.mxu1 %vm278_vm1, %v1154_v19 }
  0x2e   :  { %1073 = vmatmul.mubr.msk.bf16.gmra.mxu0 %vm278_vm1, %v1155_v20  ;;  %1105 = vmatmul.mubr.msk.bf16.gmra.mxu1 %vm278_vm1, %v1156_v21 }
  0x2f   :  { %1076 = vmatprep.mubr.msk.bf16.mxu0 %vm278_vm1, %v1157_v22  ;;  %1108 = vmatprep.mubr.msk.bf16.mxu1 %vm278_vm1, %v1158_v23 }
  0x36   :  { %1077 = vmatmul.mubr.msk.bf16.gmra.mxu0 %vm278_vm1, %v1159_v24  ;;  %1109 = vmatmul.mubr.msk.bf16.gmra.mxu1 %vm278_vm1, %v1160_v25 }
  0x37   :  { %1080 = vmatprep.mubr.msk.bf16.mxu0 %vm278_vm1, %v1161_v26  ;;  %1112 = vmatprep.mubr.msk.bf16.mxu1 %vm278_vm1, %v1162_v27 }
  0x3e   :  { %1081 = vmatmul.mubr.msk.bf16.gmra.mxu0 %vm278_vm1, %v1163_v28  ;;  %1113 = vmatmul.mubr.msk.bf16.gmra.mxu1 %vm278_vm1, %v1164_v29 }
  0x3f   :  { %1084 = vmatprep.mubr.msk.bf16.mxu0 %vm278_vm1, %v1165_v30  ;;  %1116 = vmatprep.mubr.msk.bf16.mxu1 %vm278_vm1, %v1166_v31 }
  0x46   :  { %1085 = vmatmul.mubr.msk.bf16.gmra.mxu0 %vm278_vm1, %v1167_v32  ;;  %1117 = vmatmul.mubr.msk.bf16.gmra.mxu1 %vm278_vm1, %v1168_v33 }
  0x47   :  { %1088 = vmatprep.mubr.msk.bf16.mxu0 %vm278_vm1, %v1169_v34  ;;  %1120 = vmatprep.mubr.msk.bf16.mxu1 %vm278_vm1, %v1170_v35 }
  0x4e   :  { %1089 = vmatmul.mubr.msk.bf16.gmra.mxu0 %vm278_vm1, %v1171_v36  ;;  %1121 = vmatmul.mubr.msk.bf16.gmra.mxu1 %vm278_vm1, %v1172_v37 }
  0xd6   :  { %v1062_v39 = vpop.f32.mrf.mxu0  ;;  %v1094_v41 = vpop.f32.mrf.mxu1 }
  0xd7   :  { %v677_v42 = vmul.f32 %v1062_v39, %v1344_v38  ;;  %v709_v43 = vmul.f32 %v1094_v41, %v1344_v38 }
  0xd8   :  { %v413_v44 = vpop.f32.mrf.mxu0  ;;  %v541_v45 = vpop.f32.mrf.mxu1 }
  0xd9   :  { %v748_v46 = vadd.f32 %v1349_v40, %v677_v42  ;;  %v780_v47 = vadd.f32 %v1349_v40, %v709_v43  ;;  %v675_v48 = vmul.f32 %v1344_v38, %v413_v44  ;;  %v707_v49 = vmul.f32 %v1344_v38, %v541_v45 }
  0xda   :  { %v1063_v50 = vpop.f32.mrf.mxu0  ;;  %v1095_v51 = vpop.f32.mrf.mxu1 }
  0xdb   :  { %v812_v52 = vmax.f32 %v748_v46, 0.0  ;;  %v844_v53 = vmax.f32 %v780_v47, 0.0  ;;  %v746_v54 = vadd.f32 %v1349_v40, %v675_v48  ;;  %v778_v55 = vadd.f32 %v1349_v40, %v707_v49 }
  0xdc   :  { %v678_v56 = vmul.f32 %v1063_v50, %v1344_v38  ;;  %v710_v57 = vmul.f32 %v1095_v51, %v1344_v38  ;;  %v416_v58 = vpop.f32.mrf.mxu0  ;;  %v544_v59 = vpop.f32.mrf.mxu1 }
  0xdd   :  { %876 = vst [vmem:[%s1675_s4 + $0x10] sm:$0xff] %v812_v52  ;;  %908 = vst [vmem:[%s1675_s4 + $0x110] sm:$0xff] %v844_v53  ;;  %v810_v60 = vmax.f32 %v746_v54, 0.0  ;;  %v842_v61 = vmax.f32 %v778_v55, 0.0  ;;  %v676_v62 = vmul.f32 %v1344_v38, %v416_v58  ;;  %v708_v63 = vmul.f32 %v1344_v38, %v544_v59 }
  0xde   :  { %v749_v0 = vadd.f32 %v1349_v40, %v678_v56  ;;  %v781_v1 = vadd.f32 %v1349_v40, %v710_v57  ;;  %v1066_v2 = vpop.f32.mrf.mxu0  ;;  %v1098_v3 = vpop.f32.mrf.mxu1 }
  0xdf   :  { %874 = vst [vmem:[%s1675_s4] sm:$0xff] %v810_v60  ;;  %906 = vst [vmem:[%s1675_s4 + $0x100] sm:$0xff] %v842_v61  ;;  %v747_v4 = vadd.f32 %v1349_v40, %v676_v62  ;;  %v779_v5 = vadd.f32 %v1349_v40, %v708_v63  ;;  %v681_v6 = vmul.f32 %v1066_v2, %v1344_v38 }
  0xe0   :  { %v713_v7 = vmul.f32 %v1098_v3, %v1344_v38  ;;  %v813_v8 = vmax.f32 %v749_v0, 0.0  ;;  %v845_v9 = vmax.f32 %v781_v1, 0.0  ;;  %v429_v10 = vpop.f32.mrf.mxu0  ;;  %v557_v11 = vpop.f32.mrf.mxu1 }
  0xe1   :  { %v811_v12 = vmax.f32 %v747_v4, 0.0  ;;  %v843_v13 = vmax.f32 %v779_v5, 0.0  ;;  %v752_v14 = vadd.f32 %v1349_v40, %v681_v6  ;;  %v679_v16 = vmul.f32 %v1344_v38, %v429_v10 }
  0xe2   :  { %v784_v15 = vadd.f32 %v1349_v40, %v713_v7  ;;  %877 = vst [vmem:[%s1675_s4 + $0x18] sm:$0xff] %v813_v8  ;;  %909 = vst [vmem:[%s1675_s4 + $0x118] sm:$0xff] %v845_v9  ;;  %v711_v17 = vmul.f32 %v1344_v38, %v557_v11  ;;  %v1067_v18 = vpop.f32.mrf.mxu0  ;;  %v1099_v19 = vpop.f32.mrf.mxu1 }
  0xe3   :  { %875 = vst [vmem:[%s1675_s4 + $0x8] sm:$0xff] %v811_v12  ;;  %907 = vst [vmem:[%s1675_s4 + $0x108] sm:$0xff] %v843_v13  ;;  %v816_v20 = vmax.f32 %v752_v14, 0.0  ;;  %v682_v22 = vmul.f32 %v1067_v18, %v1344_v38  ;;  %v714_v23 = vmul.f32 %v1099_v19, %v1344_v38  ;;  %v750_v24 = vadd.f32 %v1349_v40, %v679_v16 }
  0xe4   :  { %v848_v21 = vmax.f32 %v784_v15, 0.0  ;;  %v782_v25 = vadd.f32 %v1349_v40, %v711_v17  ;;  %v432_v26 = vpop.f32.mrf.mxu0  ;;  %v560_v27 = vpop.f32.mrf.mxu1 }
  0xe5   :  { %880 = vst [vmem:[%s1675_s4 + $0x30] sm:$0xff] %v816_v20  ;;  %v753_v28 = vadd.f32 %v1349_v40, %v682_v22  ;;  %v785_v29 = vadd.f32 %v1349_v40, %v714_v23  ;;  %v680_v30 = vmul.f32 %v1344_v38, %v432_v26  ;;  %v712_v31 = vmul.f32 %v1344_v38, %v560_v27 }
  0xe6   :  { %912 = vst [vmem:[%s1675_s4 + $0x130] sm:$0xff] %v848_v21  ;;  %v814_v32 = vmax.f32 %v750_v24, 0.0  ;;  %v846_v33 = vmax.f32 %v782_v25, 0.0  ;;  %v1070_v34 = vpop.f32.mrf.mxu0  ;;  %v1102_v35 = vpop.f32.mrf.mxu1 }
  0xe7   :  { %v817_v36 = vmax.f32 %v753_v28, 0.0  ;;  %v849_v37 = vmax.f32 %v785_v29, 0.0  ;;  %v751_v39 = vadd.f32 %v1349_v40, %v680_v30  ;;  %v783_v41 = vadd.f32 %v1349_v40, %v712_v31 }
  0xe8   :  { %878 = vst [vmem:[%s1675_s4 + $0x20] sm:$0xff] %v814_v32  ;;  %910 = vst [vmem:[%s1675_s4 + $0x120] sm:$0xff] %v846_v33  ;;  %v685_v42 = vmul.f32 %v1070_v34, %v1344_v38  ;;  %v717_v43 = vmul.f32 %v1102_v35, %v1344_v38  ;;  %v445_v44 = vpop.f32.mrf.mxu0  ;;  %v573_v45 = vpop.f32.mrf.mxu1 }
  0xe9   :  { %881 = vst [vmem:[%s1675_s4 + $0x38] sm:$0xff] %v817_v36  ;;  %913 = vst [vmem:[%s1675_s4 + $0x138] sm:$0xff] %v849_v37  ;;  %v815_v46 = vmax.f32 %v751_v39, 0.0  ;;  %v847_v47 = vmax.f32 %v783_v41, 0.0  ;;  %v683_v48 = vmul.f32 %v1344_v38, %v445_v44  ;;  %v715_v49 = vmul.f32 %v1344_v38, %v573_v45 }
  0xea   :  { %v756_v50 = vadd.f32 %v1349_v40, %v685_v42  ;;  %v788_v51 = vadd.f32 %v1349_v40, %v717_v43  ;;  %v1071_v52 = vpop.f32.mrf.mxu0  ;;  %v1103_v53 = vpop.f32.mrf.mxu1 }
  0xeb   :  { %879 = vst [vmem:[%s1675_s4 + $0x28] sm:$0xff] %v815_v46  ;;  %911 = vst [vmem:[%s1675_s4 + $0x128] sm:$0xff] %v847_v47  ;;  %v754_v54 = vadd.f32 %v1349_v40, %v683_v48  ;;  %v786_v55 = vadd.f32 %v1349_v40, %v715_v49  ;;  %v686_v56 = vmul.f32 %v1071_v52, %v1344_v38 }
  0xec   :  { %v718_v57 = vmul.f32 %v1103_v53, %v1344_v38  ;;  %v820_v58 = vmax.f32 %v756_v50, 0.0  ;;  %v852_v59 = vmax.f32 %v788_v51, 0.0  ;;  %v448_v60 = vpop.f32.mrf.mxu0  ;;  %v576_v61 = vpop.f32.mrf.mxu1 }
  0xed   :  { %v818_v62 = vmax.f32 %v754_v54, 0.0  ;;  %v850_v63 = vmax.f32 %v786_v55, 0.0  ;;  %v757_v0 = vadd.f32 %v1349_v40, %v686_v56  ;;  %v684_v2 = vmul.f32 %v1344_v38, %v448_v60 }
  0xee   :  { %v789_v1 = vadd.f32 %v1349_v40, %v718_v57  ;;  %884 = vst [vmem:[%s1675_s4 + $0x50] sm:$0xff] %v820_v58  ;;  %916 = vst [vmem:[%s1675_s4 + $0x150] sm:$0xff] %v852_v59  ;;  %v716_v3 = vmul.f32 %v1344_v38, %v576_v61  ;;  %v1074_v4 = vpop.f32.mrf.mxu0  ;;  %v1106_v5 = vpop.f32.mrf.mxu1 }
  0xef   :  { %882 = vst [vmem:[%s1675_s4 + $0x40] sm:$0xff] %v818_v62  ;;  %914 = vst [vmem:[%s1675_s4 + $0x140] sm:$0xff] %v850_v63  ;;  %v821_v6 = vmax.f32 %v757_v0, 0.0  ;;  %v689_v8 = vmul.f32 %v1074_v4, %v1344_v38  ;;  %v721_v9 = vmul.f32 %v1106_v5, %v1344_v38  ;;  %v755_v10 = vadd.f32 %v1349_v40, %v684_v2 }
  0xf0   :  { %v853_v7 = vmax.f32 %v789_v1, 0.0  ;;  %v787_v11 = vadd.f32 %v1349_v40, %v716_v3  ;;  %v461_v12 = vpop.f32.mrf.mxu0  ;;  %v589_v13 = vpop.f32.mrf.mxu1 }
  0xf1   :  { %885 = vst [vmem:[%s1675_s4 + $0x58] sm:$0xff] %v821_v6  ;;  %v760_v14 = vadd.f32 %v1349_v40, %v689_v8  ;;  %v792_v15 = vadd.f32 %v1349_v40, %v721_v9  ;;  %v687_v16 = vmul.f32 %v1344_v38, %v461_v12  ;;  %v719_v17 = vmul.f32 %v1344_v38, %v589_v13 }
  0xf2   :  { %917 = vst [vmem:[%s1675_s4 + $0x158] sm:$0xff] %v853_v7  ;;  %v819_v18 = vmax.f32 %v755_v10, 0.0  ;;  %v851_v19 = vmax.f32 %v787_v11, 0.0  ;;  %v1075_v20 = vpop.f32.mrf.mxu0  ;;  %v1107_v21 = vpop.f32.mrf.mxu1 }
  0xf3   :  { %v824_v22 = vmax.f32 %v760_v14, 0.0  ;;  %v856_v23 = vmax.f32 %v792_v15, 0.0  ;;  %v758_v24 = vadd.f32 %v1349_v40, %v687_v16  ;;  %v790_v25 = vadd.f32 %v1349_v40, %v719_v17 }
  0xf4   :  { %883 = vst [vmem:[%s1675_s4 + $0x48] sm:$0xff] %v819_v18  ;;  %915 = vst [vmem:[%s1675_s4 + $0x148] sm:$0xff] %v851_v19  ;;  %v690_v26 = vmul.f32 %v1075_v20, %v1344_v38  ;;  %v722_v27 = vmul.f32 %v1107_v21, %v1344_v38  ;;  %v464_v28 = vpop.f32.mrf.mxu0  ;;  %v592_v29 = vpop.f32.mrf.mxu1 }
  0xf5   :  { %888 = vst [vmem:[%s1675_s4 + $0x70] sm:$0xff] %v824_v22  ;;  %920 = vst [vmem:[%s1675_s4 + $0x170] sm:$0xff] %v856_v23  ;;  %v822_v30 = vmax.f32 %v758_v24, 0.0  ;;  %v854_v31 = vmax.f32 %v790_v25, 0.0  ;;  %v688_v32 = vmul.f32 %v1344_v38, %v464_v28  ;;  %v720_v33 = vmul.f32 %v1344_v38, %v592_v29 }
  0xf6   :  { %v761_v34 = vadd.f32 %v1349_v40, %v690_v26  ;;  %v793_v35 = vadd.f32 %v1349_v40, %v722_v27  ;;  %v1078_v36 = vpop.f32.mrf.mxu0  ;;  %v1110_v37 = vpop.f32.mrf.mxu1 }
  0xf7   :  { %886 = vst [vmem:[%s1675_s4 + $0x60] sm:$0xff] %v822_v30  ;;  %918 = vst [vmem:[%s1675_s4 + $0x160] sm:$0xff] %v854_v31  ;;  %v759_v39 = vadd.f32 %v1349_v40, %v688_v32  ;;  %v791_v41 = vadd.f32 %v1349_v40, %v720_v33  ;;  %v693_v42 = vmul.f32 %v1078_v36, %v1344_v38 }
  0xf8   :  { %v725_v43 = vmul.f32 %v1110_v37, %v1344_v38  ;;  %v825_v44 = vmax.f32 %v761_v34, 0.0  ;;  %v857_v45 = vmax.f32 %v793_v35, 0.0  ;;  %v477_v46 = vpop.f32.mrf.mxu0  ;;  %v605_v47 = vpop.f32.mrf.mxu1 }
  0xf9   :  { %v823_v48 = vmax.f32 %v759_v39, 0.0  ;;  %v855_v49 = vmax.f32 %v791_v41, 0.0  ;;  %v764_v50 = vadd.f32 %v1349_v40, %v693_v42  ;;  %v691_v52 = vmul.f32 %v1344_v38, %v477_v46 }
  0xfa   :  { %v796_v51 = vadd.f32 %v1349_v40, %v725_v43  ;;  %889 = vst [vmem:[%s1675_s4 + $0x78] sm:$0xff] %v825_v44  ;;  %921 = vst [vmem:[%s1675_s4 + $0x178] sm:$0xff] %v857_v45  ;;  %v723_v53 = vmul.f32 %v1344_v38, %v605_v47  ;;  %v1079_v54 = vpop.f32.mrf.mxu0  ;;  %v1111_v55 = vpop.f32.mrf.mxu1 }
  0xfb   :  { %887 = vst [vmem:[%s1675_s4 + $0x68] sm:$0xff] %v823_v48  ;;  %919 = vst [vmem:[%s1675_s4 + $0x168] sm:$0xff] %v855_v49  ;;  %v828_v56 = vmax.f32 %v764_v50, 0.0  ;;  %v694_v58 = vmul.f32 %v1079_v54, %v1344_v38  ;;  %v726_v59 = vmul.f32 %v1111_v55, %v1344_v38  ;;  %v762_v60 = vadd.f32 %v1349_v40, %v691_v52 }
  0xfc   :  { %v860_v57 = vmax.f32 %v796_v51, 0.0  ;;  %v794_v61 = vadd.f32 %v1349_v40, %v723_v53  ;;  %v480_v62 = vpop.f32.mrf.mxu0  ;;  %v608_v63 = vpop.f32.mrf.mxu1 }
  0xfd   :  { %892 = vst [vmem:[%s1675_s4 + $0x90] sm:$0xff] %v828_v56  ;;  %v765_v0 = vadd.f32 %v1349_v40, %v694_v58  ;;  %v797_v1 = vadd.f32 %v1349_v40, %v726_v59  ;;  %v692_v2 = vmul.f32 %v1344_v38, %v480_v62  ;;  %v724_v3 = vmul.f32 %v1344_v38, %v608_v63 }
  0xfe   :  { %924 = vst [vmem:[%s1675_s4 + $0x190] sm:$0xff] %v860_v57  ;;  %v826_v4 = vmax.f32 %v762_v60, 0.0  ;;  %v858_v5 = vmax.f32 %v794_v61, 0.0  ;;  %v1082_v6 = vpop.f32.mrf.mxu0  ;;  %v1114_v7 = vpop.f32.mrf.mxu1 }
  0xff   :  { %v829_v8 = vmax.f32 %v765_v0, 0.0  ;;  %v861_v9 = vmax.f32 %v797_v1, 0.0  ;;  %v763_v10 = vadd.f32 %v1349_v40, %v692_v2  ;;  %v795_v11 = vadd.f32 %v1349_v40, %v724_v3 }
 0x100   :  { %890 = vst [vmem:[%s1675_s4 + $0x80] sm:$0xff] %v826_v4  ;;  %922 = vst [vmem:[%s1675_s4 + $0x180] sm:$0xff] %v858_v5  ;;  %v697_v12 = vmul.f32 %v1082_v6, %v1344_v38  ;;  %v729_v13 = vmul.f32 %v1114_v7, %v1344_v38  ;;  %v493_v14 = vpop.f32.mrf.mxu0  ;;  %v621_v15 = vpop.f32.mrf.mxu1 }
 0x101   :  { %893 = vst [vmem:[%s1675_s4 + $0x98] sm:$0xff] %v829_v8  ;;  %925 = vst [vmem:[%s1675_s4 + $0x198] sm:$0xff] %v861_v9  ;;  %v827_v16 = vmax.f32 %v763_v10, 0.0  ;;  %v859_v17 = vmax.f32 %v795_v11, 0.0  ;;  %v695_v18 = vmul.f32 %v1344_v38, %v493_v14  ;;  %v727_v19 = vmul.f32 %v1344_v38, %v621_v15 }
 0x102   :  { %v768_v20 = vadd.f32 %v1349_v40, %v697_v12  ;;  %v800_v21 = vadd.f32 %v1349_v40, %v729_v13  ;;  %v1083_v22 = vpop.f32.mrf.mxu0  ;;  %v1115_v23 = vpop.f32.mrf.mxu1 }
 0x103   :  { %891 = vst [vmem:[%s1675_s4 + $0x88] sm:$0xff] %v827_v16  ;;  %923 = vst [vmem:[%s1675_s4 + $0x188] sm:$0xff] %v859_v17  ;;  %v766_v24 = vadd.f32 %v1349_v40, %v695_v18  ;;  %v798_v25 = vadd.f32 %v1349_v40, %v727_v19  ;;  %v698_v26 = vmul.f32 %v1083_v22, %v1344_v38 }
 0x104   :  { %v730_v27 = vmul.f32 %v1115_v23, %v1344_v38  ;;  %v832_v28 = vmax.f32 %v768_v20, 0.0  ;;  %v864_v29 = vmax.f32 %v800_v21, 0.0  ;;  %v496_v30 = vpop.f32.mrf.mxu0  ;;  %v624_v31 = vpop.f32.mrf.mxu1 }
 0x105   :  { %v830_v32 = vmax.f32 %v766_v24, 0.0  ;;  %v862_v33 = vmax.f32 %v798_v25, 0.0  ;;  %v769_v34 = vadd.f32 %v1349_v40, %v698_v26  ;;  %v696_v36 = vmul.f32 %v1344_v38, %v496_v30 }
 0x106   :  { %v801_v35 = vadd.f32 %v1349_v40, %v730_v27  ;;  %896 = vst [vmem:[%s1675_s4 + $0xb0] sm:$0xff] %v832_v28  ;;  %928 = vst [vmem:[%s1675_s4 + $0x1b0] sm:$0xff] %v864_v29  ;;  %v728_v37 = vmul.f32 %v1344_v38, %v624_v31  ;;  %v1086_v39 = vpop.f32.mrf.mxu0  ;;  %v1118_v41 = vpop.f32.mrf.mxu1 }
 0x107   :  { %894 = vst [vmem:[%s1675_s4 + $0xa0] sm:$0xff] %v830_v32  ;;  %926 = vst [vmem:[%s1675_s4 + $0x1a0] sm:$0xff] %v862_v33  ;;  %v833_v42 = vmax.f32 %v769_v34, 0.0  ;;  %v701_v44 = vmul.f32 %v1086_v39, %v1344_v38  ;;  %v733_v45 = vmul.f32 %v1118_v41, %v1344_v38  ;;  %v767_v46 = vadd.f32 %v1349_v40, %v696_v36 }
 0x108   :  { %v865_v43 = vmax.f32 %v801_v35, 0.0  ;;  %v799_v47 = vadd.f32 %v1349_v40, %v728_v37  ;;  %v509_v48 = vpop.f32.mrf.mxu0  ;;  %v637_v49 = vpop.f32.mrf.mxu1 }
 0x109   :  { %897 = vst [vmem:[%s1675_s4 + $0xb8] sm:$0xff] %v833_v42  ;;  %v772_v50 = vadd.f32 %v1349_v40, %v701_v44  ;;  %v804_v51 = vadd.f32 %v1349_v40, %v733_v45  ;;  %v699_v52 = vmul.f32 %v1344_v38, %v509_v48  ;;  %v731_v53 = vmul.f32 %v1344_v38, %v637_v49 }
 0x10a   :  { %929 = vst [vmem:[%s1675_s4 + $0x1b8] sm:$0xff] %v865_v43  ;;  %v831_v54 = vmax.f32 %v767_v46, 0.0  ;;  %v863_v55 = vmax.f32 %v799_v47, 0.0  ;;  %v1087_v56 = vpop.f32.mrf.mxu0  ;;  %v1119_v57 = vpop.f32.mrf.mxu1 }
 0x10b   :  { %v836_v58 = vmax.f32 %v772_v50, 0.0  ;;  %v868_v59 = vmax.f32 %v804_v51, 0.0  ;;  %v770_v60 = vadd.f32 %v1349_v40, %v699_v52  ;;  %v802_v61 = vadd.f32 %v1349_v40, %v731_v53 }
 0x10c   :  { %895 = vst [vmem:[%s1675_s4 + $0xa8] sm:$0xff] %v831_v54  ;;  %927 = vst [vmem:[%s1675_s4 + $0x1a8] sm:$0xff] %v863_v55  ;;  %v702_v62 = vmul.f32 %v1087_v56, %v1344_v38  ;;  %v734_v63 = vmul.f32 %v1119_v57, %v1344_v38  ;;  %v512_v0 = vpop.f32.mrf.mxu0  ;;  %v640_v1 = vpop.f32.mrf.mxu1 }
 0x10d   :  { %900 = vst [vmem:[%s1675_s4 + $0xd0] sm:$0xff] %v836_v58  ;;  %932 = vst [vmem:[%s1675_s4 + $0x1d0] sm:$0xff] %v868_v59  ;;  %v834_v2 = vmax.f32 %v770_v60, 0.0  ;;  %v866_v3 = vmax.f32 %v802_v61, 0.0  ;;  %v700_v4 = vmul.f32 %v1344_v38, %v512_v0  ;;  %v732_v5 = vmul.f32 %v1344_v38, %v640_v1 }
 0x10e   :  { %v773_v6 = vadd.f32 %v1349_v40, %v702_v62  ;;  %v805_v7 = vadd.f32 %v1349_v40, %v734_v63  ;;  %v1090_v8 = vpop.f32.mrf.mxu0  ;;  %v1122_v9 = vpop.f32.mrf.mxu1 }
 0x10f   :  { %898 = vst [vmem:[%s1675_s4 + $0xc0] sm:$0xff] %v834_v2  ;;  %930 = vst [vmem:[%s1675_s4 + $0x1c0] sm:$0xff] %v866_v3  ;;  %v771_v10 = vadd.f32 %v1349_v40, %v700_v4  ;;  %v803_v11 = vadd.f32 %v1349_v40, %v732_v5  ;;  %v705_v12 = vmul.f32 %v1090_v8, %v1344_v38 }
 0x110   :  { %v737_v13 = vmul.f32 %v1122_v9, %v1344_v38  ;;  %v837_v14 = vmax.f32 %v773_v6, 0.0  ;;  %v869_v15 = vmax.f32 %v805_v7, 0.0  ;;  %v525_v16 = vpop.f32.mrf.mxu0  ;;  %v653_v17 = vpop.f32.mrf.mxu1 }
 0x111   :  { %v835_v18 = vmax.f32 %v771_v10, 0.0  ;;  %v867_v19 = vmax.f32 %v803_v11, 0.0  ;;  %v776_v20 = vadd.f32 %v1349_v40, %v705_v12  ;;  %v703_v22 = vmul.f32 %v1344_v38, %v525_v16 }
 0x112   :  { %v808_v21 = vadd.f32 %v1349_v40, %v737_v13  ;;  %901 = vst [vmem:[%s1675_s4 + $0xd8] sm:$0xff] %v837_v14  ;;  %933 = vst [vmem:[%s1675_s4 + $0x1d8] sm:$0xff] %v869_v15  ;;  %v735_v23 = vmul.f32 %v1344_v38, %v653_v17  ;;  %v1091_v24 = vpop.f32.mrf.mxu0  ;;  %v1123_v25 = vpop.f32.mrf.mxu1 }
 0x113   :  { %899 = vst [vmem:[%s1675_s4 + $0xc8] sm:$0xff] %v835_v18  ;;  %931 = vst [vmem:[%s1675_s4 + $0x1c8] sm:$0xff] %v867_v19  ;;  %v840_v26 = vmax.f32 %v776_v20, 0.0  ;;  %v706_v28 = vmul.f32 %v1091_v24, %v1344_v38  ;;  %v738_v29 = vmul.f32 %v1123_v25, %v1344_v38  ;;  %v774_v30 = vadd.f32 %v1349_v40, %v703_v22 }
 0x114   :  { %v872_v27 = vmax.f32 %v808_v21, 0.0  ;;  %v806_v31 = vadd.f32 %v1349_v40, %v735_v23  ;;  %v528_v32 = vpop.f32.mrf.mxu0  ;;  %v656_v33 = vpop.f32.mrf.mxu1 }
 0x115   :  { %904 = vst [vmem:[%s1675_s4 + $0xf0] sm:$0xff] %v840_v26  ;;  %v777_v34 = vadd.f32 %v1349_v40, %v706_v28  ;;  %v809_v35 = vadd.f32 %v1349_v40, %v738_v29  ;;  %v704_v36 = vmul.f32 %v1344_v38, %v528_v32  ;;  %v736_v37 = vmul.f32 %v1344_v38, %v656_v33 }
 0x116   :  { %936 = vst [vmem:[%s1675_s4 + $0x1f0] sm:$0xff] %v872_v27  ;;  %v838_v39 = vmax.f32 %v774_v30, 0.0  ;;  %v870_v41 = vmax.f32 %v806_v31, 0.0 }
 0x117   :  { %v841_v42 = vmax.f32 %v777_v34, 0.0  ;;  %v873_v43 = vmax.f32 %v809_v35, 0.0  ;;  %v775_v44 = vadd.f32 %v1349_v40, %v704_v36  ;;  %v807_v45 = vadd.f32 %v1349_v40, %v736_v37 }
 0x118   :  { %902 = vst [vmem:[%s1675_s4 + $0xe0] sm:$0xff] %v838_v39  ;;  %934 = vst [vmem:[%s1675_s4 + $0x1e0] sm:$0xff] %v870_v41 }
 0x119   :  { %905 = vst [vmem:[%s1675_s4 + $0xf8] sm:$0xff] %v841_v42  ;;  %937 = vst [vmem:[%s1675_s4 + $0x1f8] sm:$0xff] %v873_v43  ;;  %v839_v38 = vmax.f32 %v775_v44, 0.0  ;;  %v871_v46 = vmax.f32 %v807_v45, 0.0 }
 0x11b   :  { %903 = vst [vmem:[%s1675_s4 + $0xe8] sm:$0xff] %v839_v38  ;;  %935 = vst [vmem:[%s1675_s4 + $0x1e8] sm:$0xff] %v871_v46 }

// kernel: generator_forward.9
= control target key start
LH: loop header
LB: loop body
LE: loop exit
PB: predicated region body
PF: predicated region fallthrough
CT: control target
= control target key end

     0   :  { %s1717_s15 = smov 0   ;;  %s1719_s16 = smov 0   ;;  %s2033_s0 = inlined_call_operand.vmem [shape: bf16[2048,36], index: 0, kind: input, shape index: {}]   ;;  %s2034_s1 = inlined_call_operand.vmem [shape: bf16[36,128], index: 1, kind: input, shape index: {}]   ;;  %s2035_s2 = inlined_call_operand.vmem [shape: f32[1,128], index: 2, kind: input, shape index: {}]   ;;  %s2036_s3 = inlined_call_operand.vmem [shape: f32[1,128], index: 3, kind: input, shape index: {}]   ;;  %s2037_s4 = inlined_call_operand.vmem [shape: f32[2048,128], index: 4, kind: output, shape index: {}]  }
   0x1   :  { %s1721_s17 = smov 0  }
   0x2 LB: > { %s26_s18 = sadd.s32 1, %s1686_s16  ;;  %p1292_p0 = scmp.ge.s32.totalorder %s1690_s17, 1  ;;  %s1690_s17 = sphi %s1721_s17, %s14_s17   ;;  %s1686_s16 = sphi %s1719_s16, %s2039_s16   ;;  %s1682_s15 = sphi %s1717_s15, %s2038_s15  }
   0x3   : > { %p28_p1 = scmp.ge.s32.totalorder %s26_s18, 4  ;;  %p202_p2 = scmp.lt.s32.totalorder %s1690_s17, 5 }
   0x5   : > { %s2041_s18 = smov (%p28_p1, %s26_s18), 0  ;;  %p203_p3 = pnand %p1292_p0, %p202_p2 }
   0x6   : > { %s1293_s23 = sshll.u32 (!%p203_p3), %s1682_s15, 6 }
   0x7   : > { %206 = sbr.rel (%p203_p3) target bundleno = 300 (0x12c), region = 36  ;;  %p242_p4 = scmp.lt.s32.totalorder (!%p203_p3), %s1293_s23, 255 }
   0xc   : > { %v1505_v0 = vld [vmem:[%s2034_s1 + $0x10] ss:$0 sps:$4 sm:$0x33]   ;;  %vm608_vm0 = vcmask 1041408   ;;  %v1506_v1 = vld [vmem:[%s2034_s1 + $0x8] sm:$0xff]   ;;  %v1507_v3 = vld [vmem:[%s2034_s1] sm:$0xff]  }
   0xd   : > { %1479 = vmatprep.subr.msk.bf16.mxu0 %vm608_vm0, %v1505_v0  ;;  %1480 = vmatprep.subr.msk.bf16.mxu1 %vm608_vm0, %v1505_v0  ;;  %v610_v2 = vsel %vm608_vm0, %v1505_v0, 0  ;;  %s2043_s23 = smov (!%p242_p4, %s1293_s23), 255  ;;  %vm511_vm1 = vcmask 293888   ;;  %v1819_v36 = vld [vmem:[%s2035_s2] ss:$0 sm:$0xff] }
   0xe   : > { %1404 = vmatpush3.bf16.msra.mxu0 %v610_v2  ;;  %1476 = vmatpush3.bf16.msra.mxu1 %v610_v2  ;;  %s1294_s26 = sshll.u32 %s2043_s23, 2  ;;  %v1824_v38 = vld [vmem:[%s2036_s3] ss:$0 sm:$0xff]  ;;  %s1296_s8 = sshll.u32 %s2043_s23, 3 }
   0xf   : > { %1405 = vmatprep.subr.bf16.mxu0 %v1506_v1  ;;  %1474 = vmatprep.subr.bf16.mxu1 %v1506_v1  ;;  %s1750_s29 = scalar_lea.vmem %s2033_s0, %s1294_s26  ;;  %s1859_s11 = scalar_lea.vmem %s2037_s4, %s1296_s8 }
  0x10   : > { %v1508_v4 = vld [vmem:[%s1750_s29] sm:$0xff]   ;;  %v1510_v6 = vld [vmem:[%s1750_s29 + $0x8] sm:$0xff]   ;;  %v1512_v8 = vld [vmem:[%s1750_s29 + $0x10] sm:$0xff]  }
  0x11   : > { %v1509_v5 = vld [vmem:[%s1750_s29 + $0x80] sm:$0xff]   ;;  %1409 = vmatprep.mubr.msk.bf16.mxu0 %vm511_vm1, %v1508_v4  ;;  %v1511_v7 = vld [vmem:[%s1750_s29 + $0x88] sm:$0xff]   ;;  %v1513_v9 = vld [vmem:[%s1750_s29 + $0x90] sm:$0xff]  }
  0x12   : > { %1406 = vmatpush3.bf16.msra.mxu0 %v1506_v1  ;;  %1477 = vmatpush3.bf16.msra.mxu1 %v1506_v1  ;;  %v1514_v10 = vld [vmem:[%s1750_s29 + $0x18] sm:$0xff]   ;;  %v1516_v12 = vld [vmem:[%s1750_s29 + $0x20] sm:$0xff]   ;;  %v1518_v14 = vld [vmem:[%s1750_s29 + $0x28] sm:$0xff]  }
  0x13   : > { %1407 = vmatprep.subr.bf16.mxu0 %v1507_v3  ;;  %1475 = vmatprep.subr.bf16.mxu1 %v1507_v3  ;;  %v1515_v11 = vld [vmem:[%s1750_s29 + $0x98] sm:$0xff]   ;;  %v1517_v13 = vld [vmem:[%s1750_s29 + $0xa0] sm:$0xff]   ;;  %v1519_v15 = vld [vmem:[%s1750_s29 + $0xa8] sm:$0xff]  }
  0x14   : > { %1441 = vmatprep.mubr.msk.bf16.mxu1 %vm511_vm1, %v1509_v5  ;;  %v1520_v16 = vld [vmem:[%s1750_s29 + $0x30] sm:$0xff]   ;;  %v1522_v18 = vld [vmem:[%s1750_s29 + $0x38] sm:$0xff]   ;;  %v1524_v20 = vld [vmem:[%s1750_s29 + $0x40] sm:$0xff]  }
  0x15   : > { %v1521_v17 = vld [vmem:[%s1750_s29 + $0xb0] sm:$0xff]   ;;  %v1523_v19 = vld [vmem:[%s1750_s29 + $0xb8] sm:$0xff]   ;;  %v1525_v21 = vld [vmem:[%s1750_s29 + $0xc0] sm:$0xff]  }
  0x16   : > { %1408 = vmatpush3.bf16.msra.mxu0 %v1507_v3  ;;  %1478 = vmatpush3.bf16.msra.mxu1 %v1507_v3  ;;  %v1526_v22 = vld [vmem:[%s1750_s29 + $0x48] sm:$0xff]   ;;  %v1528_v24 = vld [vmem:[%s1750_s29 + $0x50] sm:$0xff]   ;;  %v1530_v26 = vld [vmem:[%s1750_s29 + $0x58] sm:$0xff]  }
  0x17   : > { %v1527_v23 = vld [vmem:[%s1750_s29 + $0xc8] sm:$0xff]   ;;  %v1529_v25 = vld [vmem:[%s1750_s29 + $0xd0] sm:$0xff]   ;;  %v1531_v27 = vld [vmem:[%s1750_s29 + $0xd8] sm:$0xff]  }
  0x18   : > { %v1532_v28 = vld [vmem:[%s1750_s29 + $0x60] sm:$0xff]   ;;  %v1534_v30 = vld [vmem:[%s1750_s29 + $0x68] sm:$0xff]   ;;  %v1536_v32 = vld [vmem:[%s1750_s29 + $0x70] sm:$0xff]  }
  0x19   : > { %1410 = vmatmul.mubr.msk.bf16.vlgmr.msra.gmra.mxu0 %vm511_vm1, %v1510_v6  ;;  %1442 = vmatmul.mubr.msk.bf16.vlgmr.msra.gmra.mxu1 %vm511_vm1, %v1511_v7  ;;  %v1533_v29 = vld [vmem:[%s1750_s29 + $0xe0] sm:$0xff]   ;;  %v1535_v31 = vld [vmem:[%s1750_s29 + $0xe8] sm:$0xff]   ;;  %v1537_v33 = vld [vmem:[%s1750_s29 + $0xf0] sm:$0xff]  }
  0x1a   : > { %1413 = vmatprep.mubr.msk.bf16.mxu0 %vm511_vm1, %v1512_v8  ;;  %1445 = vmatprep.mubr.msk.bf16.mxu1 %vm511_vm1, %v1513_v9  ;;  %v1538_v34 = vld [vmem:[%s1750_s29 + $0x78] sm:$0xff]  }
  0x1b   : > { %v1539_v35 = vld [vmem:[%s1750_s29 + $0xf8] sm:$0xff]  }
  0x21   : > { %1414 = vmatmul.mubr.msk.bf16.gmra.mxu0 %vm511_vm1, %v1514_v10  ;;  %1446 = vmatmul.mubr.msk.bf16.gmra.mxu1 %vm511_vm1, %v1515_v11 }
  0x22   : > { %1417 = vmatprep.mubr.msk.bf16.mxu0 %vm511_vm1, %v1516_v12  ;;  %1449 = vmatprep.mubr.msk.bf16.mxu1 %vm511_vm1, %v1517_v13 }
  0x29   : > { %1418 = vmatmul.mubr.msk.bf16.gmra.mxu0 %vm511_vm1, %v1518_v14  ;;  %1450 = vmatmul.mubr.msk.bf16.gmra.mxu1 %vm511_vm1, %v1519_v15 }
  0x2a   : > { %1421 = vmatprep.mubr.msk.bf16.mxu0 %vm511_vm1, %v1520_v16  ;;  %1453 = vmatprep.mubr.msk.bf16.mxu1 %vm511_vm1, %v1521_v17 }
  0x31   : > { %1422 = vmatmul.mubr.msk.bf16.gmra.mxu0 %vm511_vm1, %v1522_v18  ;;  %1454 = vmatmul.mubr.msk.bf16.gmra.mxu1 %vm511_vm1, %v1523_v19 }
  0x32   : > { %1425 = vmatprep.mubr.msk.bf16.mxu0 %vm511_vm1, %v1524_v20  ;;  %1457 = vmatprep.mubr.msk.bf16.mxu1 %vm511_vm1, %v1525_v21 }
  0x39   : > { %1426 = vmatmul.mubr.msk.bf16.gmra.mxu0 %vm511_vm1, %v1526_v22  ;;  %1458 = vmatmul.mubr.msk.bf16.gmra.mxu1 %vm511_vm1, %v1527_v23 }
  0x3a   : > { %1429 = vmatprep.mubr.msk.bf16.mxu0 %vm511_vm1, %v1528_v24  ;;  %1461 = vmatprep.mubr.msk.bf16.mxu1 %vm511_vm1, %v1529_v25 }
  0x41   : > { %1430 = vmatmul.mubr.msk.bf16.gmra.mxu0 %vm511_vm1, %v1530_v26  ;;  %1462 = vmatmul.mubr.msk.bf16.gmra.mxu1 %vm511_vm1, %v1531_v27 }
  0x42   : > { %1433 = vmatprep.mubr.msk.bf16.mxu0 %vm511_vm1, %v1532_v28  ;;  %1465 = vmatprep.mubr.msk.bf16.mxu1 %vm511_vm1, %v1533_v29 }
  0x49   : > { %1434 = vmatmul.mubr.msk.bf16.gmra.mxu0 %vm511_vm1, %v1534_v30  ;;  %1466 = vmatmul.mubr.msk.bf16.gmra.mxu1 %vm511_vm1, %v1535_v31 }
  0x4a   : > { %1437 = vmatprep.mubr.msk.bf16.mxu0 %vm511_vm1, %v1536_v32  ;;  %1469 = vmatprep.mubr.msk.bf16.mxu1 %vm511_vm1, %v1537_v33 }
  0x51   : > { %1438 = vmatmul.mubr.msk.bf16.gmra.mxu0 %vm511_vm1, %v1538_v34  ;;  %1470 = vmatmul.mubr.msk.bf16.gmra.mxu1 %vm511_vm1, %v1539_v35 }
  0xd9   : > { %v1411_v37 = vpop.f32.mrf.mxu0  ;;  %v1443_v39 = vpop.f32.mrf.mxu1 }
  0xda   : > { %v910_v40 = vmul.f32 %v1411_v37, %v1819_v36  ;;  %v942_v41 = vmul.f32 %v1443_v39, %v1819_v36 }
  0xdb   : > { %v646_v42 = vpop.f32.mrf.mxu0  ;;  %v774_v43 = vpop.f32.mrf.mxu1 }
  0xdc   : > { %v981_v44 = vadd.f32 %v1824_v38, %v910_v40  ;;  %v1013_v45 = vadd.f32 %v1824_v38, %v942_v41  ;;  %v908_v46 = vmul.f32 %v1819_v36, %v646_v42  ;;  %v940_v47 = vmul.f32 %v1819_v36, %v774_v43 }
  0xdd   : > { %v1412_v48 = vpop.f32.mrf.mxu0  ;;  %v1444_v49 = vpop.f32.mrf.mxu1 }
  0xde   : > { %1540 = vtanh.f32 %v981_v44  ;;  %v979_v50 = vadd.f32 %v1824_v38, %v908_v46  ;;  %v1011_v51 = vadd.f32 %v1824_v38, %v940_v47  ;;  %v911_v52 = vmul.f32 %v1412_v48, %v1819_v36 }
  0xdf   : > { %1542 = vtanh.f32 %v1013_v45  ;;  %v943_v53 = vmul.f32 %v1444_v49, %v1819_v36  ;;  %v649_v54 = vpop.f32.mrf.mxu0  ;;  %v777_v55 = vpop.f32.mrf.mxu1 }
  0xe0   : > { %1544 = vtanh.f32 %v979_v50  ;;  %v982_v56 = vadd.f32 %v1824_v38, %v911_v52  ;;  %v909_v57 = vmul.f32 %v1819_v36, %v649_v54  ;;  %v941_v58 = vmul.f32 %v1819_v36, %v777_v55 }
  0xe1   : > { %1546 = vtanh.f32 %v1011_v51  ;;  %v1014_v59 = vadd.f32 %v1824_v38, %v943_v53  ;;  %v1415_v60 = vpop.f32.mrf.mxu0  ;;  %v1447_v61 = vpop.f32.mrf.mxu1 }
  0xe2   : > { %1548 = vtanh.f32 %v982_v56  ;;  %v980_v62 = vadd.f32 %v1824_v38, %v909_v57  ;;  %v1012_v63 = vadd.f32 %v1824_v38, %v941_v58  ;;  %v914_v0 = vmul.f32 %v1415_v60, %v1819_v36 }
  0xe3   : > { %1550 = vtanh.f32 %v1014_v59  ;;  %v946_v1 = vmul.f32 %v1447_v61, %v1819_v36  ;;  %v662_v2 = vpop.f32.mrf.mxu0  ;;  %v790_v3 = vpop.f32.mrf.mxu1 }
  0xe4   : > { %1552 = vtanh.f32 %v980_v62  ;;  %v985_v4 = vadd.f32 %v1824_v38, %v914_v0  ;;  %v912_v5 = vmul.f32 %v1819_v36, %v662_v2  ;;  %v944_v6 = vmul.f32 %v1819_v36, %v790_v3 }
  0xe5   : > { %1554 = vtanh.f32 %v1012_v63  ;;  %v1017_v7 = vadd.f32 %v1824_v38, %v946_v1  ;;  %v1416_v8 = vpop.f32.mrf.mxu0  ;;  %v1448_v9 = vpop.f32.mrf.mxu1 }
  0xe6   : > { %1556 = vtanh.f32 %v985_v4  ;;  %v983_v10 = vadd.f32 %v1824_v38, %v912_v5  ;;  %v1015_v11 = vadd.f32 %v1824_v38, %v944_v6  ;;  %v915_v12 = vmul.f32 %v1416_v8, %v1819_v36 }
  0xe7   : > { %1558 = vtanh.f32 %v1017_v7  ;;  %v947_v13 = vmul.f32 %v1448_v9, %v1819_v36  ;;  %v665_v14 = vpop.f32.mrf.mxu0  ;;  %v793_v15 = vpop.f32.mrf.mxu1 }
  0xe8   : > { %1560 = vtanh.f32 %v983_v10  ;;  %v986_v16 = vadd.f32 %v1824_v38, %v915_v12  ;;  %v913_v17 = vmul.f32 %v1819_v36, %v665_v14  ;;  %v945_v18 = vmul.f32 %v1819_v36, %v793_v15 }
  0xe9   : > { %1562 = vtanh.f32 %v1015_v11  ;;  %v1018_v19 = vadd.f32 %v1824_v38, %v947_v13  ;;  %v1419_v20 = vpop.f32.mrf.mxu0  ;;  %v1451_v21 = vpop.f32.mrf.mxu1 }
  0xea   : > { %1564 = vtanh.f32 %v986_v16  ;;  %v984_v22 = vadd.f32 %v1824_v38, %v913_v17  ;;  %v1016_v23 = vadd.f32 %v1824_v38, %v945_v18  ;;  %v918_v24 = vmul.f32 %v1419_v20, %v1819_v36 }
  0xeb   : > { %v1541_v25 = vpop.eup %1540  ;;  %1566 = vtanh.f32 %v1018_v19  ;;  %v950_v26 = vmul.f32 %v1451_v21, %v1819_v36  ;;  %v678_v27 = vpop.f32.mrf.mxu0 }
  0xec   : > { %v806_v28 = vpop.f32.mrf.mxu1  ;;  %v1543_v29 = vpop.eup %1542  ;;  %1109 = vst [vmem:[%s1859_s11 + $0x10] sm:$0xff] %v1541_v25  ;;  %1568 = vtanh.f32 %v984_v22  ;;  %v989_v30 = vadd.f32 %v1824_v38, %v918_v24  ;;  %v916_v31 = vmul.f32 %v1819_v36, %v678_v27 }
  0xed   : > { %v948_v32 = vmul.f32 %v1819_v36, %v806_v28  ;;  %v1545_v33 = vpop.eup %1544  ;;  %1141 = vst [vmem:[%s1859_s11 + $0x110] sm:$0xff] %v1543_v29  ;;  %1570 = vtanh.f32 %v1016_v23  ;;  %v1021_v34 = vadd.f32 %v1824_v38, %v950_v26  ;;  %v1420_v35 = vpop.f32.mrf.mxu0 }
  0xee   : > { %v1452_v37 = vpop.f32.mrf.mxu1  ;;  %v1547_v39 = vpop.eup %1546  ;;  %1107 = vst [vmem:[%s1859_s11] sm:$0xff] %v1545_v33  ;;  %1572 = vtanh.f32 %v989_v30  ;;  %v987_v40 = vadd.f32 %v1824_v38, %v916_v31  ;;  %v919_v42 = vmul.f32 %v1420_v35, %v1819_v36 }
  0xef   : > { %v1019_v41 = vadd.f32 %v1824_v38, %v948_v32  ;;  %v1549_v43 = vpop.eup %1548  ;;  %1139 = vst [vmem:[%s1859_s11 + $0x100] sm:$0xff] %v1547_v39  ;;  %1574 = vtanh.f32 %v1021_v34  ;;  %v951_v44 = vmul.f32 %v1452_v37, %v1819_v36  ;;  %v681_v45 = vpop.f32.mrf.mxu0 }
  0xf0   : > { %v809_v46 = vpop.f32.mrf.mxu1  ;;  %v1551_v47 = vpop.eup %1550  ;;  %1110 = vst [vmem:[%s1859_s11 + $0x18] sm:$0xff] %v1549_v43  ;;  %1576 = vtanh.f32 %v987_v40  ;;  %v990_v48 = vadd.f32 %v1824_v38, %v919_v42  ;;  %v917_v49 = vmul.f32 %v1819_v36, %v681_v45 }
  0xf1   : > { %v949_v50 = vmul.f32 %v1819_v36, %v809_v46  ;;  %v1553_v51 = vpop.eup %1552  ;;  %1142 = vst [vmem:[%s1859_s11 + $0x118] sm:$0xff] %v1551_v47  ;;  %1578 = vtanh.f32 %v1019_v41  ;;  %v1022_v52 = vadd.f32 %v1824_v38, %v951_v44  ;;  %v1423_v53 = vpop.f32.mrf.mxu0 }
  0xf2   : > { %v1455_v54 = vpop.f32.mrf.mxu1  ;;  %v1555_v55 = vpop.eup %1554  ;;  %1108 = vst [vmem:[%s1859_s11 + $0x8] sm:$0xff] %v1553_v51  ;;  %1580 = vtanh.f32 %v990_v48  ;;  %v988_v56 = vadd.f32 %v1824_v38, %v917_v49  ;;  %v922_v58 = vmul.f32 %v1423_v53, %v1819_v36 }
  0xf3   : > { %v1020_v57 = vadd.f32 %v1824_v38, %v949_v50  ;;  %v1557_v59 = vpop.eup %1556  ;;  %1140 = vst [vmem:[%s1859_s11 + $0x108] sm:$0xff] %v1555_v55  ;;  %1582 = vtanh.f32 %v1022_v52  ;;  %v954_v60 = vmul.f32 %v1455_v54, %v1819_v36  ;;  %v694_v61 = vpop.f32.mrf.mxu0 }
  0xf4   : > { %v822_v62 = vpop.f32.mrf.mxu1  ;;  %v1559_v63 = vpop.eup %1558  ;;  %1113 = vst [vmem:[%s1859_s11 + $0x30] sm:$0xff] %v1557_v59  ;;  %1584 = vtanh.f32 %v988_v56  ;;  %v993_v0 = vadd.f32 %v1824_v38, %v922_v58  ;;  %v920_v1 = vmul.f32 %v1819_v36, %v694_v61 }
  0xf5   : > { %v952_v2 = vmul.f32 %v1819_v36, %v822_v62  ;;  %v1561_v3 = vpop.eup %1560  ;;  %1145 = vst [vmem:[%s1859_s11 + $0x130] sm:$0xff] %v1559_v63  ;;  %1586 = vtanh.f32 %v1020_v57  ;;  %v1025_v4 = vadd.f32 %v1824_v38, %v954_v60  ;;  %v1424_v5 = vpop.f32.mrf.mxu0 }
  0xf6   : > { %v1456_v6 = vpop.f32.mrf.mxu1  ;;  %v1563_v7 = vpop.eup %1562  ;;  %1111 = vst [vmem:[%s1859_s11 + $0x20] sm:$0xff] %v1561_v3  ;;  %1588 = vtanh.f32 %v993_v0  ;;  %v991_v8 = vadd.f32 %v1824_v38, %v920_v1  ;;  %v923_v10 = vmul.f32 %v1424_v5, %v1819_v36 }
  0xf7   : > { %v1023_v9 = vadd.f32 %v1824_v38, %v952_v2  ;;  %v1565_v11 = vpop.eup %1564  ;;  %1143 = vst [vmem:[%s1859_s11 + $0x120] sm:$0xff] %v1563_v7  ;;  %1590 = vtanh.f32 %v1025_v4  ;;  %v955_v12 = vmul.f32 %v1456_v6, %v1819_v36  ;;  %v697_v13 = vpop.f32.mrf.mxu0 }
  0xf8   : > { %v825_v14 = vpop.f32.mrf.mxu1  ;;  %v1567_v15 = vpop.eup %1566  ;;  %1114 = vst [vmem:[%s1859_s11 + $0x38] sm:$0xff] %v1565_v11  ;;  %1592 = vtanh.f32 %v991_v8  ;;  %v994_v16 = vadd.f32 %v1824_v38, %v923_v10  ;;  %v921_v17 = vmul.f32 %v1819_v36, %v697_v13 }
  0xf9   : > { %v953_v18 = vmul.f32 %v1819_v36, %v825_v14  ;;  %v1569_v19 = vpop.eup %1568  ;;  %1146 = vst [vmem:[%s1859_s11 + $0x138] sm:$0xff] %v1567_v15  ;;  %1594 = vtanh.f32 %v1023_v9  ;;  %v1026_v20 = vadd.f32 %v1824_v38, %v955_v12  ;;  %v1427_v21 = vpop.f32.mrf.mxu0 }
  0xfa   : > { %v1459_v22 = vpop.f32.mrf.mxu1  ;;  %v1571_v23 = vpop.eup %1570  ;;  %1112 = vst [vmem:[%s1859_s11 + $0x28] sm:$0xff] %v1569_v19  ;;  %1596 = vtanh.f32 %v994_v16  ;;  %v992_v24 = vadd.f32 %v1824_v38, %v921_v17  ;;  %v926_v26 = vmul.f32 %v1427_v21, %v1819_v36 }
  0xfb   : > { %v1024_v25 = vadd.f32 %v1824_v38, %v953_v18  ;;  %v1573_v27 = vpop.eup %1572  ;;  %1144 = vst [vmem:[%s1859_s11 + $0x128] sm:$0xff] %v1571_v23  ;;  %1598 = vtanh.f32 %v1026_v20  ;;  %v958_v28 = vmul.f32 %v1459_v22, %v1819_v36  ;;  %v710_v29 = vpop.f32.mrf.mxu0 }
  0xfc   : > { %v838_v30 = vpop.f32.mrf.mxu1  ;;  %v1575_v31 = vpop.eup %1574  ;;  %1117 = vst [vmem:[%s1859_s11 + $0x50] sm:$0xff] %v1573_v27  ;;  %1600 = vtanh.f32 %v992_v24  ;;  %v997_v32 = vadd.f32 %v1824_v38, %v926_v26  ;;  %v924_v33 = vmul.f32 %v1819_v36, %v710_v29 }
  0xfd   : > { %v956_v34 = vmul.f32 %v1819_v36, %v838_v30  ;;  %v1577_v35 = vpop.eup %1576  ;;  %1149 = vst [vmem:[%s1859_s11 + $0x150] sm:$0xff] %v1575_v31  ;;  %1602 = vtanh.f32 %v1024_v25  ;;  %v1029_v37 = vadd.f32 %v1824_v38, %v958_v28  ;;  %v1428_v39 = vpop.f32.mrf.mxu0 }
  0xfe   : > { %v1460_v40 = vpop.f32.mrf.mxu1  ;;  %v1579_v41 = vpop.eup %1578  ;;  %1115 = vst [vmem:[%s1859_s11 + $0x40] sm:$0xff] %v1577_v35  ;;  %1604 = vtanh.f32 %v997_v32  ;;  %v995_v42 = vadd.f32 %v1824_v38, %v924_v33  ;;  %v927_v44 = vmul.f32 %v1428_v39, %v1819_v36 }
  0xff   : > { %v1027_v43 = vadd.f32 %v1824_v38, %v956_v34  ;;  %v1581_v45 = vpop.eup %1580  ;;  %1147 = vst [vmem:[%s1859_s11 + $0x140] sm:$0xff] %v1579_v41  ;;  %1606 = vtanh.f32 %v1029_v37  ;;  %v959_v46 = vmul.f32 %v1460_v40, %v1819_v36  ;;  %v713_v47 = vpop.f32.mrf.mxu0 }
 0x100   : > { %v841_v48 = vpop.f32.mrf.mxu1  ;;  %v1583_v49 = vpop.eup %1582  ;;  %1118 = vst [vmem:[%s1859_s11 + $0x58] sm:$0xff] %v1581_v45  ;;  %1608 = vtanh.f32 %v995_v42  ;;  %v998_v50 = vadd.f32 %v1824_v38, %v927_v44  ;;  %v925_v51 = vmul.f32 %v1819_v36, %v713_v47 }
 0x101   : > { %v957_v52 = vmul.f32 %v1819_v36, %v841_v48  ;;  %v1585_v53 = vpop.eup %1584  ;;  %1150 = vst [vmem:[%s1859_s11 + $0x158] sm:$0xff] %v1583_v49  ;;  %1610 = vtanh.f32 %v1027_v43  ;;  %v1030_v54 = vadd.f32 %v1824_v38, %v959_v46  ;;  %v1431_v55 = vpop.f32.mrf.mxu0 }
 0x102   : > { %v1463_v56 = vpop.f32.mrf.mxu1  ;;  %v1587_v57 = vpop.eup %1586  ;;  %1116 = vst [vmem:[%s1859_s11 + $0x48] sm:$0xff] %v1585_v53  ;;  %1612 = vtanh.f32 %v998_v50  ;;  %v996_v58 = vadd.f32 %v1824_v38, %v925_v51  ;;  %v930_v60 = vmul.f32 %v1431_v55, %v1819_v36 }
 0x103   : > { %v1028_v59 = vadd.f32 %v1824_v38, %v957_v52  ;;  %v1589_v61 = vpop.eup %1588  ;;  %1148 = vst [vmem:[%s1859_s11 + $0x148] sm:$0xff] %v1587_v57  ;;  %1614 = vtanh.f32 %v1030_v54  ;;  %v962_v62 = vmul.f32 %v1463_v56, %v1819_v36  ;;  %v726_v63 = vpop.f32.mrf.mxu0 }
 0x104   : > { %v854_v0 = vpop.f32.mrf.mxu1  ;;  %v1591_v1 = vpop.eup %1590  ;;  %1121 = vst [vmem:[%s1859_s11 + $0x70] sm:$0xff] %v1589_v61  ;;  %1616 = vtanh.f32 %v996_v58  ;;  %v1001_v2 = vadd.f32 %v1824_v38, %v930_v60  ;;  %v928_v3 = vmul.f32 %v1819_v36, %v726_v63 }
 0x105   : > { %v960_v4 = vmul.f32 %v1819_v36, %v854_v0  ;;  %v1593_v5 = vpop.eup %1592  ;;  %1153 = vst [vmem:[%s1859_s11 + $0x170] sm:$0xff] %v1591_v1  ;;  %1618 = vtanh.f32 %v1028_v59  ;;  %v1033_v6 = vadd.f32 %v1824_v38, %v962_v62  ;;  %v1432_v7 = vpop.f32.mrf.mxu0 }
 0x106   : > { %v1464_v8 = vpop.f32.mrf.mxu1  ;;  %v1595_v9 = vpop.eup %1594  ;;  %1119 = vst [vmem:[%s1859_s11 + $0x60] sm:$0xff] %v1593_v5  ;;  %1620 = vtanh.f32 %v1001_v2  ;;  %v999_v10 = vadd.f32 %v1824_v38, %v928_v3  ;;  %v931_v12 = vmul.f32 %v1432_v7, %v1819_v36 }
 0x107   : > { %v1031_v11 = vadd.f32 %v1824_v38, %v960_v4  ;;  %v1597_v13 = vpop.eup %1596  ;;  %1151 = vst [vmem:[%s1859_s11 + $0x160] sm:$0xff] %v1595_v9  ;;  %1622 = vtanh.f32 %v1033_v6  ;;  %v963_v14 = vmul.f32 %v1464_v8, %v1819_v36  ;;  %v729_v15 = vpop.f32.mrf.mxu0 }
 0x108   : > { %v857_v16 = vpop.f32.mrf.mxu1  ;;  %v1599_v17 = vpop.eup %1598  ;;  %1122 = vst [vmem:[%s1859_s11 + $0x78] sm:$0xff] %v1597_v13  ;;  %1624 = vtanh.f32 %v999_v10  ;;  %v1002_v18 = vadd.f32 %v1824_v38, %v931_v12  ;;  %v929_v19 = vmul.f32 %v1819_v36, %v729_v15 }
 0x109   : > { %v961_v20 = vmul.f32 %v1819_v36, %v857_v16  ;;  %v1601_v21 = vpop.eup %1600  ;;  %1154 = vst [vmem:[%s1859_s11 + $0x178] sm:$0xff] %v1599_v17  ;;  %1626 = vtanh.f32 %v1031_v11  ;;  %v1034_v22 = vadd.f32 %v1824_v38, %v963_v14  ;;  %v1435_v23 = vpop.f32.mrf.mxu0 }
 0x10a   : > { %v1467_v24 = vpop.f32.mrf.mxu1  ;;  %v1603_v25 = vpop.eup %1602  ;;  %1120 = vst [vmem:[%s1859_s11 + $0x68] sm:$0xff] %v1601_v21  ;;  %1628 = vtanh.f32 %v1002_v18  ;;  %v1000_v26 = vadd.f32 %v1824_v38, %v929_v19  ;;  %v934_v28 = vmul.f32 %v1435_v23, %v1819_v36 }
 0x10b   : > { %v1032_v27 = vadd.f32 %v1824_v38, %v961_v20  ;;  %v1605_v29 = vpop.eup %1604  ;;  %1152 = vst [vmem:[%s1859_s11 + $0x168] sm:$0xff] %v1603_v25  ;;  %1630 = vtanh.f32 %v1034_v22  ;;  %v966_v30 = vmul.f32 %v1467_v24, %v1819_v36  ;;  %v742_v31 = vpop.f32.mrf.mxu0 }
 0x10c   : > { %v870_v32 = vpop.f32.mrf.mxu1  ;;  %v1607_v33 = vpop.eup %1606  ;;  %1125 = vst [vmem:[%s1859_s11 + $0x90] sm:$0xff] %v1605_v29  ;;  %1632 = vtanh.f32 %v1000_v26  ;;  %v1005_v34 = vadd.f32 %v1824_v38, %v934_v28  ;;  %v932_v35 = vmul.f32 %v1819_v36, %v742_v31 }
 0x10d   : > { %v964_v37 = vmul.f32 %v1819_v36, %v870_v32  ;;  %v1609_v39 = vpop.eup %1608  ;;  %1157 = vst [vmem:[%s1859_s11 + $0x190] sm:$0xff] %v1607_v33  ;;  %1634 = vtanh.f32 %v1032_v27  ;;  %v1037_v40 = vadd.f32 %v1824_v38, %v966_v30  ;;  %v1436_v41 = vpop.f32.mrf.mxu0 }
 0x10e   : > { %v1468_v42 = vpop.f32.mrf.mxu1  ;;  %v1611_v43 = vpop.eup %1610  ;;  %1123 = vst [vmem:[%s1859_s11 + $0x80] sm:$0xff] %v1609_v39  ;;  %1636 = vtanh.f32 %v1005_v34  ;;  %v1003_v44 = vadd.f32 %v1824_v38, %v932_v35  ;;  %v935_v46 = vmul.f32 %v1436_v41, %v1819_v36 }
 0x10f   : > { %v1035_v45 = vadd.f32 %v1824_v38, %v964_v37  ;;  %v1613_v47 = vpop.eup %1612  ;;  %1155 = vst [vmem:[%s1859_s11 + $0x180] sm:$0xff] %v1611_v43  ;;  %1638 = vtanh.f32 %v1037_v40  ;;  %v967_v48 = vmul.f32 %v1468_v42, %v1819_v36  ;;  %v745_v49 = vpop.f32.mrf.mxu0 }
 0x110   : > { %v873_v50 = vpop.f32.mrf.mxu1  ;;  %v1615_v51 = vpop.eup %1614  ;;  %1126 = vst [vmem:[%s1859_s11 + $0x98] sm:$0xff] %v1613_v47  ;;  %1640 = vtanh.f32 %v1003_v44  ;;  %v1006_v52 = vadd.f32 %v1824_v38, %v935_v46  ;;  %v933_v53 = vmul.f32 %v1819_v36, %v745_v49 }
 0x111   : > { %v965_v54 = vmul.f32 %v1819_v36, %v873_v50  ;;  %v1617_v55 = vpop.eup %1616  ;;  %1158 = vst [vmem:[%s1859_s11 + $0x198] sm:$0xff] %v1615_v51  ;;  %1642 = vtanh.f32 %v1035_v45  ;;  %v1038_v56 = vadd.f32 %v1824_v38, %v967_v48  ;;  %v1439_v57 = vpop.f32.mrf.mxu0 }
 0x112   : > { %v1471_v58 = vpop.f32.mrf.mxu1  ;;  %v1619_v59 = vpop.eup %1618  ;;  %1124 = vst [vmem:[%s1859_s11 + $0x88] sm:$0xff] %v1617_v55  ;;  %1644 = vtanh.f32 %v1006_v52  ;;  %v1004_v60 = vadd.f32 %v1824_v38, %v933_v53  ;;  %v938_v62 = vmul.f32 %v1439_v57, %v1819_v36 }
 0x113   : > { %v1036_v61 = vadd.f32 %v1824_v38, %v965_v54  ;;  %v1621_v63 = vpop.eup %1620  ;;  %1156 = vst [vmem:[%s1859_s11 + $0x188] sm:$0xff] %v1619_v59  ;;  %1646 = vtanh.f32 %v1038_v56  ;;  %v970_v0 = vmul.f32 %v1471_v58, %v1819_v36  ;;  %v758_v1 = vpop.f32.mrf.mxu0 }
 0x114   : > { %v886_v2 = vpop.f32.mrf.mxu1  ;;  %v1623_v3 = vpop.eup %1622  ;;  %1129 = vst [vmem:[%s1859_s11 + $0xb0] sm:$0xff] %v1621_v63  ;;  %1648 = vtanh.f32 %v1004_v60  ;;  %v1009_v4 = vadd.f32 %v1824_v38, %v938_v62  ;;  %v936_v5 = vmul.f32 %v1819_v36, %v758_v1 }
 0x115   : > { %v968_v6 = vmul.f32 %v1819_v36, %v886_v2  ;;  %v1625_v7 = vpop.eup %1624  ;;  %1161 = vst [vmem:[%s1859_s11 + $0x1b0] sm:$0xff] %v1623_v3  ;;  %1650 = vtanh.f32 %v1036_v61  ;;  %v1041_v8 = vadd.f32 %v1824_v38, %v970_v0  ;;  %v1440_v9 = vpop.f32.mrf.mxu0 }
 0x116   : > { %v1472_v10 = vpop.f32.mrf.mxu1  ;;  %v1627_v11 = vpop.eup %1626  ;;  %1127 = vst [vmem:[%s1859_s11 + $0xa0] sm:$0xff] %v1625_v7  ;;  %1652 = vtanh.f32 %v1009_v4  ;;  %v1007_v12 = vadd.f32 %v1824_v38, %v936_v5  ;;  %v939_v14 = vmul.f32 %v1440_v9, %v1819_v36 }
 0x117   : > { %v1039_v13 = vadd.f32 %v1824_v38, %v968_v6  ;;  %v1629_v15 = vpop.eup %1628  ;;  %1159 = vst [vmem:[%s1859_s11 + $0x1a0] sm:$0xff] %v1627_v11  ;;  %1654 = vtanh.f32 %v1041_v8  ;;  %v971_v16 = vmul.f32 %v1472_v10, %v1819_v36  ;;  %v761_v17 = vpop.f32.mrf.mxu0 }
 0x118   : > { %v889_v18 = vpop.f32.mrf.mxu1  ;;  %v1631_v19 = vpop.eup %1630  ;;  %1130 = vst [vmem:[%s1859_s11 + $0xb8] sm:$0xff] %v1629_v15  ;;  %1656 = vtanh.f32 %v1007_v12  ;;  %v1010_v20 = vadd.f32 %v1824_v38, %v939_v14  ;;  %v937_v21 = vmul.f32 %v1819_v36, %v761_v17 }
 0x119   : > { %v969_v22 = vmul.f32 %v1819_v36, %v889_v18  ;;  %v1633_v23 = vpop.eup %1632  ;;  %1162 = vst [vmem:[%s1859_s11 + $0x1b8] sm:$0xff] %v1631_v19  ;;  %1658 = vtanh.f32 %v1039_v13  ;;  %v1042_v24 = vadd.f32 %v1824_v38, %v971_v16 }
 0x11a   : > { %v1635_v25 = vpop.eup %1634  ;;  %1128 = vst [vmem:[%s1859_s11 + $0xa8] sm:$0xff] %v1633_v23  ;;  %1660 = vtanh.f32 %v1010_v20  ;;  %v1008_v26 = vadd.f32 %v1824_v38, %v937_v21 }
 0x11b   : > { %v1040_v27 = vadd.f32 %v1824_v38, %v969_v22  ;;  %v1637_v28 = vpop.eup %1636  ;;  %1160 = vst [vmem:[%s1859_s11 + $0x1a8] sm:$0xff] %v1635_v25  ;;  %1662 = vtanh.f32 %v1042_v24 }
 0x11c   : > { %v1639_v36 = vpop.eup %1638  ;;  %1133 = vst [vmem:[%s1859_s11 + $0xd0] sm:$0xff] %v1637_v28  ;;  %1664 = vtanh.f32 %v1008_v26 }
 0x11d   : > { %v1641_v29 = vpop.eup %1640  ;;  %1165 = vst [vmem:[%s1859_s11 + $0x1d0] sm:$0xff] %v1639_v36  ;;  %1666 = vtanh.f32 %v1040_v27 }
 0x11e   : > { %v1643_v30 = vpop.eup %1642  ;;  %1131 = vst [vmem:[%s1859_s11 + $0xc0] sm:$0xff] %v1641_v29 }
 0x11f   : > { %v1645_v31 = vpop.eup %1644  ;;  %1163 = vst [vmem:[%s1859_s11 + $0x1c0] sm:$0xff] %v1643_v30 }
 0x120   : > { %v1647_v38 = vpop.eup %1646  ;;  %1134 = vst [vmem:[%s1859_s11 + $0xd8] sm:$0xff] %v1645_v31 }
 0x121   : > { %v1649_v32 = vpop.eup %1648  ;;  %1166 = vst [vmem:[%s1859_s11 + $0x1d8] sm:$0xff] %v1647_v38 }
 0x122   : > { %v1651_v33 = vpop.eup %1650  ;;  %1132 = vst [vmem:[%s1859_s11 + $0xc8] sm:$0xff] %v1649_v32 }
 0x123   : > { %v1653_v34 = vpop.eup %1652  ;;  %1164 = vst [vmem:[%s1859_s11 + $0x1c8] sm:$0xff] %v1651_v33 }
 0x124   : > { %v1655_v35 = vpop.eup %1654  ;;  %1137 = vst [vmem:[%s1859_s11 + $0xf0] sm:$0xff] %v1653_v34 }
 0x125   : > { %v1657_v37 = vpop.eup %1656  ;;  %1169 = vst [vmem:[%s1859_s11 + $0x1f0] sm:$0xff] %v1655_v35 }
 0x126   : > { %v1659_v39 = vpop.eup %1658  ;;  %1135 = vst [vmem:[%s1859_s11 + $0xe0] sm:$0xff] %v1657_v37 }
 0x127   : > { %v1661_v40 = vpop.eup %1660  ;;  %1167 = vst [vmem:[%s1859_s11 + $0x1e0] sm:$0xff] %v1659_v39 }
 0x128   : > { %v1663_v41 = vpop.eup %1662  ;;  %1138 = vst [vmem:[%s1859_s11 + $0xf8] sm:$0xff] %v1661_v40 }
 0x129   : > { %v1665_v42 = vpop.eup %1664  ;;  %1170 = vst [vmem:[%s1859_s11 + $0x1f8] sm:$0xff] %v1663_v41 }
 0x12a   : > { %v1667_v43 = vpop.eup %1666  ;;  %1136 = vst [vmem:[%s1859_s11 + $0xe8] sm:$0xff] %v1665_v42 }
 0x12b   : > { %1168 = vst [vmem:[%s1859_s11 + $0x1e8] sm:$0xff] %v1667_v43 }
 0x12c PF: > { %s14_s17 = sadd.s32 1, %s1690_s17   ;;  %s2038_s15 = smov %s1686_s16 }
 0x12d   : > { %p11_p5 = scmp.ge.s32.totalorder %s14_s17, 6   ;;  %s2039_s16 = smov %s2041_s18 }
 0x12f   :  { %13 = sbr.rel (!%p11_p5) target bundleno = 2 (0x2), region = 75 }

</bundles_post_ra>
